<compile_context>
chip_gen: v6e
topology: v6e:2x2x1
jax: 0.10.0
libtpu: 0.0.40
codegen_flags: <defaults>
</compile_context>

<pallas_src>
import functools

import jax
import jax.numpy as jnp
from jax.experimental import pallas as pl
from jax.experimental.pallas import tpu as pltpu

VMEM_SPEC = pl.BlockSpec(memory_space=pltpu.MemorySpace.VMEM)


# ----------------------------------------------------------------- kernel ---

def _graphsage_fused_kernel(h0_ref, adj_ref, invdeg_ref, snorm_ref, mean_ref,
                            w0s_ref, w0n_ref, wrs_ref, wrn_ref,
                            b_ref, gamma_ref, beta_ref,
                            out_ref, h_buf, *, n_rest):
    inv_deg = invdeg_ref[...]                       # (N, 1) f32, 1/in-degree
    snorm = snorm_ref[...]                          # (N, 1) f32, graph-size norm

    def layer(h, w_self, w_nb, b, gamma, beta):
        # Two lane-dense projections (no sub-128-lane slicing of a fused output).
        p_self = jnp.dot(h, w_self, preferred_element_type=jnp.float32)   # (N, H)
        p_nb = jnp.dot(h, w_nb, preferred_element_type=jnp.float32)       # (N, H)
        # Mean aggregation over incoming edges, applied after projection (commutes).
        # bf16 x bf16 MXU path with f32 accumulation; adj counts are exact in bf16.
        c = jnp.dot(adj_ref[...], p_nb.astype(jnp.bfloat16),
                    preferred_element_type=jnp.float32) * inv_deg         # (N, H)
        pre = p_self + c + b
        # Row-wise L2 normalisation (F.normalize, p=2, eps=1e-12).
        ss = jnp.sum(pre * pre, axis=-1, keepdims=True)
        pre = pre * jax.lax.rsqrt(jnp.maximum(ss, 1e-24))
        act = jnp.maximum(pre, 0.0)                 # ReLU
        act = act * snorm                           # graph-size normalisation
        # BatchNorm1d, training-mode (biased) batch stats, single reduction pass,
        # gamma folded into the rsqrt scale.
        m = jnp.mean(act, axis=0, keepdims=True)
        m2 = jnp.mean(act * act, axis=0, keepdims=True)
        var = m2 - m * m
        scale = gamma * jax.lax.rsqrt(var + 1e-5)
        return (act - m) * scale + beta             # residual disabled (default False)

    # Layer 0 (Din may differ from H) ...
    h_buf[...] = layer(h0_ref[...], w0s_ref[...], w0n_ref[...],
                       b_ref[0], gamma_ref[0], beta_ref[0])
    # ... remaining equal-width layers, statically unrolled (small L),
    # hidden state resident in VMEM scratch.
    for l in range(n_rest):
        h_buf[...] = layer(h_buf[...], wrs_ref[l], wrn_ref[l],
                           b_ref[l + 1], gamma_ref[l + 1], beta_ref[l + 1])

    # dgl.mean_nodes readout: per-graph mean of the final node features.
    out_ref[...] = jnp.dot(mean_ref[...], h_buf[...],
                           preferred_element_type=jnp.float32)


# ---------------------------------------------------------------- wrapper ---

def _vmem_limit_bytes(N, in_dim, H, L, G):
    """Derive the VMEM scope from actual resident buffer sizes (+ headroom)."""
    buf = 0
    buf += N * N * 2                                 # adj (bf16)
    buf += N * in_dim * 4                            # h0
    buf += 2 * N * 4                                 # inv_deg + snorm
    buf += G * N * 4                                 # mean_mat
    buf += 2 * in_dim * H * 4                        # w0 self / nb
    buf += 2 * max(L - 1, 1) * H * H * 4             # wr self / nb
    buf += 3 * L * H * 4                             # b, gamma, beta
    buf += N * H * 4                                 # h_buf scratch
    buf += G * H * 4                                 # out
    limit = int(buf * 2.5) + (8 << 20)               # compiler temps / DMA buffers
    return max(16 << 20, min(limit, 100 << 20))


def graphsage_net_forward(graph_ops, nodes_feat, edges_feat,
                          nodes_num_norm_sqrt, edges_num_norm_sqrt, params):
    # edges_feat / edges_num_norm_sqrt are accepted for interface parity with the
    # PyTorch module but are unused by GraphSageNet1.
    del edges_feat, edges_num_norm_sqrt
    adj_cnt, inv_deg, mean_mat = graph_ops
    N, in_dim = nodes_feat.shape
    G = mean_mat.shape[0]
    H = params["b"].shape[-1]
    L = params["b"].shape[0]
    n_rest = L - 1                                  # layers after the first

    kern = functools.partial(_graphsage_fused_kernel, n_rest=n_rest)
    return pl.pallas_call(
        kern,
        out_shape=jax.ShapeDtypeStruct((G, H), jnp.float32),
        in_specs=[VMEM_SPEC] * 12,
        out_specs=VMEM_SPEC,
        scratch_shapes=[pltpu.VMEM((N, H), jnp.float32)],
        compiler_params=pltpu.CompilerParams(
            vmem_limit_bytes=_vmem_limit_bytes(N, in_dim, H, L, G)),
    )(nodes_feat, adj_cnt, inv_deg, nodes_num_norm_sqrt, mean_mat,
      params["w0_self"], params["w0_nb"], params["wr_self"], params["wr_nb"],
      params["b"], params["gamma"], params["beta"])


# ------------------------------------------------------------- param init ---

def init_params(key, in_dim, hidden_dims):
    hidden_dims = tuple(hidden_dims)
    H = hidden_dims[0]
    assert all(h == H for h in hidden_dims), "fused kernel stacks equal-width layers"
    L = len(hidden_dims)
    keys = jax.random.split(key, L)

    def linear(k, d_in):
        # nn.Linear(2*d_in, H): stored transposed and split into self / neighbour
        # halves so the kernel never slices at a non-128 lane boundary.
        ks, kn, kb = jax.random.split(k, 3)
        w_self = jax.random.normal(ks, (d_in, H), jnp.float32) * 0.1
        w_nb = jax.random.normal(kn, (d_in, H), jnp.float32) * 0.1
        bb = jax.random.normal(kb, (1, H), jnp.float32) * 0.1
        return w_self, w_nb, bb

    w0s, w0n, b0 = linear(keys[0], in_dim)
    wrs_list, wrn_list, b_list = [], [], [b0]
    for i in range(1, L):
        wsi, wni, bi = linear(keys[i], H)
        wrs_list.append(wsi)
        wrn_list.append(wni)
        b_list.append(bi)
    if wrs_list:
        wr_self = jnp.stack(wrs_list)               # (L-1, H, H)
        wr_nb = jnp.stack(wrn_list)                 # (L-1, H, H)
    else:
        wr_self = jnp.zeros((1, H, H), jnp.float32)  # dummy, unused when L == 1
        wr_nb = jnp.zeros((1, H, H), jnp.float32)
    b = jnp.stack(b_list)                           # (L, 1, H)
    gamma = jnp.ones((L, 1, H), jnp.float32)        # BatchNorm1d defaults
    beta = jnp.zeros((L, 1, H), jnp.float32)
    return dict(w0_self=w0s, w0_nb=w0n, wr_self=wr_self, wr_nb=wr_nb,
                b=b, gamma=gamma, beta=beta)


# ------------------------------------------------------------------ graph ---

def build_batched_ring_graph(num_graphs, nodes_per_graph):
    """Batched bidirectional-ring graphs (every node has in-degree 2)."""
    srcs, dsts = [], []
    for g in range(num_graphs):
        off = g * nodes_per_graph
        for i in range(nodes_per_graph):
            j = (i + 1) % nodes_per_graph
            srcs += [off + i, off + j]
            dsts += [off + j, off + i]
    srcs = jnp.array(srcs, jnp.int32)
    dsts = jnp.array(dsts, jnp.int32)
    N = num_graphs * nodes_per_graph
    E = srcs.shape[0]

    src_oh = jax.nn.one_hot(srcs, N, dtype=jnp.float32)          # (E, N)
    dst_oh = jax.nn.one_hot(dsts, N, dtype=jnp.float32)          # (E, N)
    # Dense aggregation operator: count of edges j->i.  Small exact integers, so bf16
    # storage is lossless, halves the bytes of the largest graph tensor, and feeds the
    # MXU's native bf16 path directly inside the kernel.
    adj_cnt = jnp.dot(dst_oh.T, src_oh).astype(jnp.bfloat16)     # (N, N)
    in_deg = jnp.sum(dst_oh, axis=0)                             # (N,)
    inv_deg = (1.0 / jnp.maximum(in_deg, 1.0)).reshape(N, 1).astype(jnp.float32)
    mean_mat = (jnp.repeat(jnp.eye(num_graphs, dtype=jnp.float32),
                           nodes_per_graph, axis=1) / nodes_per_graph)  # (G, N)
    snorm_n = jnp.full((N, 1), 1.0 / jnp.sqrt(float(nodes_per_graph)), jnp.float32)
    snorm_e = jnp.full((E, 1), 1.0 / jnp.sqrt(float(2 * nodes_per_graph)), jnp.float32)
    return (adj_cnt, inv_deg, mean_mat), snorm_n, snorm_e, N, E


# ------------------------------------------------------------------- main ---

if __name__ == "__main__":
    key = jax.random.PRNGKey(0)
    in_dim = 16                                   # first layer Din != H exercised
    hidden_dims = (32, 32)
    num_graphs, nodes_per_graph = 2, 64           # N = 128 nodes, E = 256 edges

    graph_ops, snorm_n, snorm_e, N, E = build_batched_ring_graph(
        num_graphs, nodes_per_graph)

    k_nf, k_ef, k_par = jax.random.split(key, 3)
    nodes_feat = jax.random.normal(k_nf, (N, in_dim), jnp.float32)
    edges_feat = jax.random.normal(k_ef, (E, 1), jnp.float32)    # unused by GraphSage

    params = init_params(k_par, in_dim, hidden_dims)

    hg = graphsage_net_forward(graph_ops, nodes_feat, edges_feat,
                               snorm_n, snorm_e, params)
    hg = jax.block_until_ready(hg)
    assert hg.shape == (num_graphs, hidden_dims[-1])
    assert bool(jnp.all(jnp.isfinite(hg)))
    print("KERNEL_OK")
</pallas_src>

<mosaic_0001>
module attributes {stable_mosaic.version = 11 : i64} {
  func.func @_graphsage_fused_kernel(%arg0: memref<128x16xf32, #tpu.memory_space<vmem>>, %arg1: memref<128x128xbf16, #tpu.memory_space<vmem>>, %arg2: memref<128x1xf32, #tpu.memory_space<vmem>>, %arg3: memref<128x1xf32, #tpu.memory_space<vmem>>, %arg4: memref<2x128xf32, #tpu.memory_space<vmem>>, %arg5: memref<16x32xf32, #tpu.memory_space<vmem>>, %arg6: memref<16x32xf32, #tpu.memory_space<vmem>>, %arg7: memref<1x32x32xf32, #tpu.memory_space<vmem>>, %arg8: memref<1x32x32xf32, #tpu.memory_space<vmem>>, %arg9: memref<2x1x32xf32, #tpu.memory_space<vmem>>, %arg10: memref<2x1x32xf32, #tpu.memory_space<vmem>>, %arg11: memref<2x1x32xf32, #tpu.memory_space<vmem>>, %arg12: memref<2x32xf32, #tpu.memory_space<vmem>>, %arg13: memref<128x32xf32, #tpu.memory_space<vmem>>) attributes {dimension_semantics = [], scalar_prefetch = 0 : i64, scratch_operands = 1 : i64, tpu.core_type = #tpu.core_type<tc>} {
    %c0 = arith.constant 0 : index
    %c0_0 = arith.constant 0 : index
    %0 = vector.load %arg2[%c0, %c0_0] : memref<128x1xf32, #tpu.memory_space<vmem>>, vector<128x1xf32>
    %c0_1 = arith.constant 0 : index
    %c0_2 = arith.constant 0 : index
    %1 = vector.load %arg3[%c0_1, %c0_2] : memref<128x1xf32, #tpu.memory_space<vmem>>, vector<128x1xf32>
    %c0_3 = arith.constant 0 : index
    %c0_4 = arith.constant 0 : index
    %2 = vector.load %arg0[%c0_3, %c0_4] : memref<128x16xf32, #tpu.memory_space<vmem>>, vector<128x16xf32>
    %c0_5 = arith.constant 0 : index
    %c0_6 = arith.constant 0 : index
    %3 = vector.load %arg5[%c0_5, %c0_6] : memref<16x32xf32, #tpu.memory_space<vmem>>, vector<16x32xf32>
    %c0_7 = arith.constant 0 : index
    %c0_8 = arith.constant 0 : index
    %4 = vector.load %arg6[%c0_7, %c0_8] : memref<16x32xf32, #tpu.memory_space<vmem>>, vector<16x32xf32>
    %c0_9 = arith.constant 0 : index
    %c0_10 = arith.constant 0 : index
    %c0_11 = arith.constant 0 : index
    %5 = vector.load %arg9[%c0_9, %c0_10, %c0_11] : memref<2x1x32xf32, #tpu.memory_space<vmem>>, vector<1x1x32xf32>
    %6 = vector.shape_cast %5 : vector<1x1x32xf32> to vector<1x32xf32>
    %c0_12 = arith.constant 0 : index
    %c0_13 = arith.constant 0 : index
    %c0_14 = arith.constant 0 : index
    %7 = vector.load %arg10[%c0_12, %c0_13, %c0_14] : memref<2x1x32xf32, #tpu.memory_space<vmem>>, vector<1x1x32xf32>
    %8 = vector.shape_cast %7 : vector<1x1x32xf32> to vector<1x32xf32>
    %c0_15 = arith.constant 0 : index
    %c0_16 = arith.constant 0 : index
    %c0_17 = arith.constant 0 : index
    %9 = vector.load %arg11[%c0_15, %c0_16, %c0_17] : memref<2x1x32xf32, #tpu.memory_space<vmem>>, vector<1x1x32xf32>
    %10 = vector.shape_cast %9 : vector<1x1x32xf32> to vector<1x32xf32>
    %cst = arith.constant dense<0.000000e+00> : vector<128x32xf32>
    %11 = tpu.matmul %2, %3, %cst {dimension_numbers = #tpu.dot_dimension_numbers<[1], [0], [0], [1], [0, 0, 1, 1], [], []>} : vector<128x16xf32>, vector<16x32xf32>, vector<128x32xf32> -> vector<128x32xf32>
    %cst_18 = arith.constant dense<0.000000e+00> : vector<128x32xf32>
    %12 = tpu.matmul %2, %4, %cst_18 {dimension_numbers = #tpu.dot_dimension_numbers<[1], [0], [0], [1], [0, 0, 1, 1], [], []>} : vector<128x16xf32>, vector<16x32xf32>, vector<128x32xf32> -> vector<128x32xf32>
    %c0_19 = arith.constant 0 : index
    %c0_20 = arith.constant 0 : index
    %13 = vector.load %arg1[%c0_19, %c0_20] : memref<128x128xbf16, #tpu.memory_space<vmem>>, vector<128x128xbf16>
    %14 = arith.truncf %12 : vector<128x32xf32> to vector<128x32xbf16>
    %cst_21 = arith.constant dense<0.000000e+00> : vector<128x32xf32>
    %15 = tpu.matmul %13, %14, %cst_21 {dimension_numbers = #tpu.dot_dimension_numbers<[1], [0], [0], [1], [0, 0, 1, 1], [], []>} : vector<128x128xbf16>, vector<128x32xbf16>, vector<128x32xf32> -> vector<128x32xf32>
    %16 = vector.broadcast %0 : vector<128x1xf32> to vector<128x32xf32>
    %17 = arith.mulf %15, %16 : vector<128x32xf32>
    %18 = arith.addf %11, %17 : vector<128x32xf32>
    %19 = vector.broadcast %6 : vector<1x32xf32> to vector<128x32xf32>
    %20 = arith.addf %18, %19 : vector<128x32xf32>
    %21 = arith.mulf %20, %20 : vector<128x32xf32>
    %cst_22 = arith.constant dense<0.000000e+00> : vector<128xf32>
    %22 = vector.multi_reduction <add>, %21, %cst_22 [1] : vector<128x32xf32> to vector<128xf32>
    %23 = vector.shape_cast %22 : vector<128xf32> to vector<128x1xf32>
    %cst_23 = arith.constant 1.000000e-24 : f32
    %24 = vector.broadcast %cst_23 : f32 to vector<128x1xf32>
    %25 = arith.maximumf %23, %24 : vector<128x1xf32>
    %26 = math.rsqrt %25 : vector<128x1xf32>
    %27 = vector.broadcast %26 : vector<128x1xf32> to vector<128x32xf32>
    %28 = arith.mulf %20, %27 : vector<128x32xf32>
    %cst_24 = arith.constant 0.000000e+00 : f32
    %29 = vector.broadcast %cst_24 : f32 to vector<128x32xf32>
    %30 = arith.maximumf %28, %29 : vector<128x32xf32>
    %31 = vector.broadcast %1 : vector<128x1xf32> to vector<128x32xf32>
    %32 = arith.mulf %30, %31 : vector<128x32xf32>
    %cst_25 = arith.constant dense<0.000000e+00> : vector<32xf32>
    %33 = vector.multi_reduction <add>, %32, %cst_25 [0] : vector<128x32xf32> to vector<32xf32>
    %34 = vector.shape_cast %33 : vector<32xf32> to vector<1x32xf32>
    %cst_26 = arith.constant 1.280000e+02 : f32
    %35 = vector.broadcast %cst_26 : f32 to vector<1x32xf32>
    %36 = arith.divf %34, %35 : vector<1x32xf32>
    %37 = arith.mulf %32, %32 : vector<128x32xf32>
    %cst_27 = arith.constant dense<0.000000e+00> : vector<32xf32>
    %38 = vector.multi_reduction <add>, %37, %cst_27 [0] : vector<128x32xf32> to vector<32xf32>
    %39 = vector.shape_cast %38 : vector<32xf32> to vector<1x32xf32>
    %cst_28 = arith.constant 1.280000e+02 : f32
    %40 = vector.broadcast %cst_28 : f32 to vector<1x32xf32>
    %41 = arith.divf %39, %40 : vector<1x32xf32>
    %42 = arith.mulf %36, %36 : vector<1x32xf32>
    %43 = arith.subf %41, %42 : vector<1x32xf32>
    %cst_29 = arith.constant 9.99999974E-6 : f32
    %44 = vector.broadcast %cst_29 : f32 to vector<1x32xf32>
    %45 = arith.addf %43, %44 : vector<1x32xf32>
    %46 = math.rsqrt %45 : vector<1x32xf32>
    %47 = arith.mulf %8, %46 : vector<1x32xf32>
    %48 = vector.broadcast %36 : vector<1x32xf32> to vector<128x32xf32>
    %49 = arith.subf %32, %48 : vector<128x32xf32>
    %50 = vector.broadcast %47 : vector<1x32xf32> to vector<128x32xf32>
    %51 = arith.mulf %49, %50 : vector<128x32xf32>
    %52 = vector.broadcast %10 : vector<1x32xf32> to vector<128x32xf32>
    %53 = arith.addf %51, %52 : vector<128x32xf32>
    %c0_30 = arith.constant 0 : index
    %c0_31 = arith.constant 0 : index
    %54 = vector.load %arg13[%c0_30, %c0_31] : memref<128x32xf32, #tpu.memory_space<vmem>>, vector<128x32xf32>
    tpu.vector_store %arg13[%c0_30, %c0_31], %53 {strides = array<i32>} : memref<128x32xf32, #tpu.memory_space<vmem>>, vector<128x32xf32>,
    %c0_32 = arith.constant 0 : index
    %c0_33 = arith.constant 0 : index
    %55 = vector.load %arg13[%c0_32, %c0_33] : memref<128x32xf32, #tpu.memory_space<vmem>>, vector<128x32xf32>
    %c0_34 = arith.constant 0 : index
    %c0_35 = arith.constant 0 : index
    %c0_36 = arith.constant 0 : index
    %56 = vector.load %arg7[%c0_34, %c0_35, %c0_36] : memref<1x32x32xf32, #tpu.memory_space<vmem>>, vector<1x32x32xf32>
    %57 = vector.shape_cast %56 : vector<1x32x32xf32> to vector<32x32xf32>
    %c0_37 = arith.constant 0 : index
    %c0_38 = arith.constant 0 : index
    %c0_39 = arith.constant 0 : index
    %58 = vector.load %arg8[%c0_37, %c0_38, %c0_39] : memref<1x32x32xf32, #tpu.memory_space<vmem>>, vector<1x32x32xf32>
    %59 = vector.shape_cast %58 : vector<1x32x32xf32> to vector<32x32xf32>
    %c1 = arith.constant 1 : index
    %c0_40 = arith.constant 0 : index
    %c0_41 = arith.constant 0 : index
    %60 = vector.load %arg9[%c1, %c0_40, %c0_41] : memref<2x1x32xf32, #tpu.memory_space<vmem>>, vector<1x1x32xf32>
    %61 = vector.shape_cast %60 : vector<1x1x32xf32> to vector<1x32xf32>
    %c1_42 = arith.constant 1 : index
    %c0_43 = arith.constant 0 : index
    %c0_44 = arith.constant 0 : index
    %62 = vector.load %arg10[%c1_42, %c0_43, %c0_44] : memref<2x1x32xf32, #tpu.memory_space<vmem>>, vector<1x1x32xf32>
    %63 = vector.shape_cast %62 : vector<1x1x32xf32> to vector<1x32xf32>
    %c1_45 = arith.constant 1 : index
    %c0_46 = arith.constant 0 : index
    %c0_47 = arith.constant 0 : index
    %64 = vector.load %arg11[%c1_45, %c0_46, %c0_47] : memref<2x1x32xf32, #tpu.memory_space<vmem>>, vector<1x1x32xf32>
    %65 = vector.shape_cast %64 : vector<1x1x32xf32> to vector<1x32xf32>
    %cst_48 = arith.constant dense<0.000000e+00> : vector<128x32xf32>
    %66 = tpu.matmul %55, %57, %cst_48 {dimension_numbers = #tpu.dot_dimension_numbers<[1], [0], [0], [1], [0, 0, 1, 1], [], []>} : vector<128x32xf32>, vector<32x32xf32>, vector<128x32xf32> -> vector<128x32xf32>
    %cst_49 = arith.constant dense<0.000000e+00> : vector<128x32xf32>
    %67 = tpu.matmul %55, %59, %cst_49 {dimension_numbers = #tpu.dot_dimension_numbers<[1], [0], [0], [1], [0, 0, 1, 1], [], []>} : vector<128x32xf32>, vector<32x32xf32>, vector<128x32xf32> -> vector<128x32xf32>
    %c0_50 = arith.constant 0 : index
    %c0_51 = arith.constant 0 : index
    %68 = vector.load %arg1[%c0_50, %c0_51] : memref<128x128xbf16, #tpu.memory_space<vmem>>, vector<128x128xbf16>
    %69 = arith.truncf %67 : vector<128x32xf32> to vector<128x32xbf16>
    %cst_52 = arith.constant dense<0.000000e+00> : vector<128x32xf32>
    %70 = tpu.matmul %68, %69, %cst_52 {dimension_numbers = #tpu.dot_dimension_numbers<[1], [0], [0], [1], [0, 0, 1, 1], [], []>} : vector<128x128xbf16>, vector<128x32xbf16>, vector<128x32xf32> -> vector<128x32xf32>
    %71 = vector.broadcast %0 : vector<128x1xf32> to vector<128x32xf32>
    %72 = arith.mulf %70, %71 : vector<128x32xf32>
    %73 = arith.addf %66, %72 : vector<128x32xf32>
    %74 = vector.broadcast %61 : vector<1x32xf32> to vector<128x32xf32>
    %75 = arith.addf %73, %74 : vector<128x32xf32>
    %76 = arith.mulf %75, %75 : vector<128x32xf32>
    %cst_53 = arith.constant dense<0.000000e+00> : vector<128xf32>
    %77 = vector.multi_reduction <add>, %76, %cst_53 [1] : vector<128x32xf32> to vector<128xf32>
    %78 = vector.shape_cast %77 : vector<128xf32> to vector<128x1xf32>
    %cst_54 = arith.constant 1.000000e-24 : f32
    %79 = vector.broadcast %cst_54 : f32 to vector<128x1xf32>
    %80 = arith.maximumf %78, %79 : vector<128x1xf32>
    %81 = math.rsqrt %80 : vector<128x1xf32>
    %82 = vector.broadcast %81 : vector<128x1xf32> to vector<128x32xf32>
    %83 = arith.mulf %75, %82 : vector<128x32xf32>
    %cst_55 = arith.constant 0.000000e+00 : f32
    %84 = vector.broadcast %cst_55 : f32 to vector<128x32xf32>
    %85 = arith.maximumf %83, %84 : vector<128x32xf32>
    %86 = vector.broadcast %1 : vector<128x1xf32> to vector<128x32xf32>
    %87 = arith.mulf %85, %86 : vector<128x32xf32>
    %cst_56 = arith.constant dense<0.000000e+00> : vector<32xf32>
    %88 = vector.multi_reduction <add>, %87, %cst_56 [0] : vector<128x32xf32> to vector<32xf32>
    %89 = vector.shape_cast %88 : vector<32xf32> to vector<1x32xf32>
    %cst_57 = arith.constant 1.280000e+02 : f32
    %90 = vector.broadcast %cst_57 : f32 to vector<1x32xf32>
    %91 = arith.divf %89, %90 : vector<1x32xf32>
    %92 = arith.mulf %87, %87 : vector<128x32xf32>
    %cst_58 = arith.constant dense<0.000000e+00> : vector<32xf32>
    %93 = vector.multi_reduction <add>, %92, %cst_58 [0] : vector<128x32xf32> to vector<32xf32>
    %94 = vector.shape_cast %93 : vector<32xf32> to vector<1x32xf32>
    %cst_59 = arith.constant 1.280000e+02 : f32
    %95 = vector.broadcast %cst_59 : f32 to vector<1x32xf32>
    %96 = arith.divf %94, %95 : vector<1x32xf32>
    %97 = arith.mulf %91, %91 : vector<1x32xf32>
    %98 = arith.subf %96, %97 : vector<1x32xf32>
    %cst_60 = arith.constant 9.99999974E-6 : f32
    %99 = vector.broadcast %cst_60 : f32 to vector<1x32xf32>
    %100 = arith.addf %98, %99 : vector<1x32xf32>
    %101 = math.rsqrt %100 : vector<1x32xf32>
    %102 = arith.mulf %63, %101 : vector<1x32xf32>
    %103 = vector.broadcast %91 : vector<1x32xf32> to vector<128x32xf32>
    %104 = arith.subf %87, %103 : vector<128x32xf32>
    %105 = vector.broadcast %102 : vector<1x32xf32> to vector<128x32xf32>
    %106 = arith.mulf %104, %105 : vector<128x32xf32>
    %107 = vector.broadcast %65 : vector<1x32xf32> to vector<128x32xf32>
    %108 = arith.addf %106, %107 : vector<128x32xf32>
    %c0_61 = arith.constant 0 : index
    %c0_62 = arith.constant 0 : index
    %109 = vector.load %arg13[%c0_61, %c0_62] : memref<128x32xf32, #tpu.memory_space<vmem>>, vector<128x32xf32>
    tpu.vector_store %arg13[%c0_61, %c0_62], %108 {strides = array<i32>} : memref<128x32xf32, #tpu.memory_space<vmem>>, vector<128x32xf32>,
    %c0_63 = arith.constant 0 : index
    %c0_64 = arith.constant 0 : index
    %110 = vector.load %arg4[%c0_63, %c0_64] : memref<2x128xf32, #tpu.memory_space<vmem>>, vector<2x128xf32>
    %c0_65 = arith.constant 0 : index
    %c0_66 = arith.constant 0 : index
    %111 = vector.load %arg13[%c0_65, %c0_66] : memref<128x32xf32, #tpu.memory_space<vmem>>, vector<128x32xf32>
    %cst_67 = arith.constant dense<0.000000e+00> : vector<2x32xf32>
    %112 = tpu.matmul %110, %111, %cst_67 {dimension_numbers = #tpu.dot_dimension_numbers<[1], [0], [0], [1], [0, 0, 1, 1], [], []>} : vector<2x128xf32>, vector<128x32xf32>, vector<2x32xf32> -> vector<2x32xf32>
    %c0_68 = arith.constant 0 : index
    %c0_69 = arith.constant 0 : index
    %113 = vector.load %arg12[%c0_68, %c0_69] : memref<2x32xf32, #tpu.memory_space<vmem>>, vector<2x32xf32>
    tpu.vector_store %arg12[%c0_68, %c0_69], %112 {strides = array<i32>} : memref<2x32xf32, #tpu.memory_space<vmem>>, vector<2x32xf32>,
    return
  }
}

</mosaic_0001>

<bundles_post_ra>
// kernel: tpu_custom_call.1
= control target key start
LH: loop header
LB: loop body
LE: loop exit
PB: predicated region body
PF: predicated region fallthrough
CT: control target
= control target key end

     0   :  { %vm98_vm0 = vcmask 130048   ;;  %s3809_s0 = inlined_call_operand.vmem [shape: f32[128,16], index: 0, kind: input, shape index: {}]   ;;  %s3810_s1 = inlined_call_operand.vmem [shape: bf16[128,128], index: 1, kind: input, shape index: {}]   ;;  %s3811_s2 = inlined_call_operand.vmem [shape: f32[128,1], index: 2, kind: input, shape index: {}]   ;;  %s3812_s3 = inlined_call_operand.vmem [shape: f32[128,1], index: 3, kind: input, shape index: {}]   ;;  %s3813_s4 = inlined_call_operand.vmem [shape: f32[2,128], index: 4, kind: input, shape index: {}]   ;;  %s3814_s5 = inlined_call_operand.vmem [shape: f32[16,32], index: 5, kind: input, shape index: {}]   ;;  %s3815_s6 = inlined_call_operand.vmem [shape: f32[16,32], index: 6, kind: input, shape index: {}]   ;;  %s3816_s7 = inlined_call_operand.vmem [shape: f32[1,32,32], index: 7, kind: input, shape index: {}]   ;;  %s3817_s8 = inlined_call_operand.vmem [shape: f32[1,32,32], index: 8, kind: input, shape index: {}]   ;;  %s3818_s9 = inlined_call_operand.vmem [shape: f32[2,1,32], index: 9, kind: input, shape index: {}]   ;;  %s3819_s10 = inlined_call_operand.vmem [shape: f32[2,1,32], index: 10, kind: input, shape index: {}]   ;;  %s3820_s11 = inlined_call_operand.vmem [shape: f32[2,1,32], index: 11, kind: input, shape index: {}]   ;;  %s3821_s12 = inlined_call_operand.hbm [shape: f32[2,32], index: 12, kind: output, shape index: {}]  }
   0x1   :  { %v94_v0 = vld [vmem:[%s3815_s6 + $0x8] sm:$0xff]  ;;  %v93_v1 = vld [vmem:[%s3815_s6] sm:$0xff]  ;;  %v2767_v4 = vld [vmem:[%s3809_s0 + $0x10] sm:$0xff] }
   0x2   :  { %v2755_v2 = vld [vmem:[%s3809_s0] sm:$0xff]  ;;  %2330 = vmatprep.subr.mxu0 %v94_v0  ;;  %v2762_v3 = vld [vmem:[%s3809_s0 + $0x8] sm:$0xff]  ;;  %v2774_v5 = vld [vmem:[%s3809_s0 + $0x18] sm:$0xff] }
   0x3   :  { %2334 = vmatprep.mubr.msk.f32.mxu0 %vm98_vm0, %v2755_v2  ;;  %2331 = vmatpush3.msra.mxu0 %v94_v0  ;;  %v2779_v6 = vld [vmem:[%s3809_s0 + $0x20] sm:$0xff]  ;;  %v2786_v7 = vld [vmem:[%s3809_s0 + $0x28] sm:$0xff]  ;;  %v2793_v8 = vld [vmem:[%s3809_s0 + $0x30] sm:$0xff] }
   0x4   :  { %2332 = vmatprep.subr.mxu0 %v93_v1  ;;  %v2800_v9 = vld [vmem:[%s3809_s0 + $0x38] sm:$0xff]  ;;  %v2807_v10 = vld [vmem:[%s3809_s0 + $0x40] sm:$0xff] }
   0x5   :  { %2333 = vmatpush3.msra.mxu0 %v93_v1 }
   0x6   :  { %2335 = vmatmul.mubr.msk.f32.vlgmr.msra.gmra.mxu0 %vm98_vm0, %v2762_v3 }
   0x7   :  { %2337 = vmatprep.mubr.msk.f32.mxu0 %vm98_vm0, %v2767_v4 }
   0xa   :  { %2338 = vmatmul.mubr.msk.f32.gmra.mxu0 %vm98_vm0, %v2774_v5 }
   0xb   :  { %2340 = vmatprep.mubr.msk.f32.mxu0 %vm98_vm0, %v2779_v6 }
   0xe   :  { %2341 = vmatmul.mubr.msk.f32.gmra.mxu0 %vm98_vm0, %v2786_v7 }
   0xf   :  { %2343 = vmatprep.mubr.msk.f32.mxu0 %vm98_vm0, %v2793_v8 }
  0x10   :  { %17 = vsyncpa [#allocation4], 0  ;;  %v2818_v11 = vld [vmem:[%s3809_s0 + $0x48] sm:$0xff]  ;;  %v2823_v12 = vld [vmem:[%s3809_s0 + $0x50] sm:$0xff]  ;;  %v2677_v20 = vmov 0   ;;  %vm740_vm1 = vcmask 261120  }
  0x11   :  { %v2832_v13 = vld [vmem:[%s3809_s0 + $0x58] sm:$0xff]  ;;  %v2837_v14 = vld [vmem:[%s3809_s0 + $0x60] sm:$0xff]  ;;  %v2846_v15 = vld [vmem:[%s3809_s0 + $0x68] sm:$0xff]  ;;  %2569 = vset.pattern.permute.xlu0 %v2677_v20  ;;  %2570 = vset.pattern.permute.xlu1 %v2677_v20  ;;  %vm2679_vm2 = vmmov 0   ;;  %s2680_s14 = smov [#allocation3]   ;;  %vm2102_vm3 = vcmask 254976  }
  0x12   :  { %2344 = vmatmul.mubr.msk.f32.gmra.mxu0 %vm98_vm0, %v2800_v9  ;;  %v2851_v16 = vld [vmem:[%s3809_s0 + $0x70] sm:$0xff]  ;;  %v2860_v17 = vld [vmem:[%s3809_s0 + $0x78] sm:$0xff]  ;;  %v2571_v18 = vld [vmem:[%s3810_s1] sm:$0xff]  }
  0x13   :  { %2346 = vmatprep.mubr.msk.f32.mxu0 %vm98_vm0, %v2807_v10  ;;  %v2572_v19 = vld [vmem:[%s3810_s1 + $0x10] sm:$0xff]   ;;  %v43_v21 = vld [vmem:[%s3811_s2] sm:$0xff]  ;;  %v44_v22 = vld [vmem:[%s3811_s2 + $0x8] sm:$0xff] }
  0x14   :  { %2378 = vmatprep.mubr.bf16.mxu1 %v2572_v19  ;;  %463 = vperm.xlu0 %2569, %v43_v21   ;;  %v47_v23 = vld [vmem:[%s3811_s2 + $0x20] sm:$0xff]  ;;  %v49_v24 = vld [vmem:[%s3811_s2 + $0x30] sm:$0xff]  ;;  %v46_v31 = vld [vmem:[%s3811_s2 + $0x18] sm:$0xff] }
  0x15   :  { %v51_v25 = vld [vmem:[%s3811_s2 + $0x40] sm:$0xff]  ;;  %v53_v26 = vld [vmem:[%s3811_s2 + $0x50] sm:$0xff]  ;;  %v48_v33 = vld [vmem:[%s3811_s2 + $0x28] sm:$0xff] }
  0x16   :  { %2347 = vmatmul.mubr.msk.f32.gmra.mxu0 %vm98_vm0, %v2818_v11  ;;  %v55_v27 = vld [vmem:[%s3811_s2 + $0x60] sm:$0xff]  ;;  %v57_v28 = vld [vmem:[%s3811_s2 + $0x70] sm:$0xff]  ;;  %v62_v34 = vld [vmem:[%s3812_s3 + $0x18] sm:$0xff] }
  0x17   :  { %2349 = vmatprep.mubr.msk.f32.mxu0 %vm98_vm0, %v2823_v12  ;;  %v45_v29 = vld [vmem:[%s3811_s2 + $0x10] sm:$0xff]  ;;  %v59_v30 = vld [vmem:[%s3812_s3] sm:$0xff]  ;;  %v50_v35 = vld [vmem:[%s3811_s2 + $0x38] sm:$0xff] }
  0x18   :  { %468 = vperm.xlu0 %2569, %v44_v22   ;;  %473 = vperm.xlu1 %2570, %v45_v29   ;;  %v61_v32 = vld [vmem:[%s3812_s3 + $0x10] sm:$0xff]  ;;  %v63_v36 = vld [vmem:[%s3812_s3 + $0x20] sm:$0xff]  ;;  %v52_v37 = vld [vmem:[%s3811_s2 + $0x48] sm:$0xff] }
  0x19   :  { %v64_v38 = vld [vmem:[%s3812_s3 + $0x28] sm:$0xff]  ;;  %v54_v39 = vld [vmem:[%s3811_s2 + $0x58] sm:$0xff]  ;;  %v65_v40 = vld [vmem:[%s3812_s3 + $0x30] sm:$0xff] }
  0x1a   :  { %2350 = vmatmul.mubr.msk.f32.gmra.mxu0 %vm98_vm0, %v2832_v13  ;;  %v56_v41 = vld [vmem:[%s3811_s2 + $0x68] sm:$0xff]  ;;  %v66_v42 = vld [vmem:[%s3812_s3 + $0x38] sm:$0xff]  ;;  %v67_v46 = vld [vmem:[%s3812_s3 + $0x40] sm:$0xff] }
  0x1b   :  { %2352 = vmatprep.mubr.msk.f32.mxu0 %vm98_vm0, %v2837_v14  ;;  %v58_v43 = vld [vmem:[%s3811_s2 + $0x78] sm:$0xff]  ;;  %v60_v47 = vld [vmem:[%s3812_s3 + $0x8] sm:$0xff]  ;;  %v69_v53 = vld [vmem:[%s3812_s3 + $0x50] sm:$0xff]  ;;  %s2110_s2 = sshll.u32 %s2680_s14, 4  ;;  %s2111_s2 = int_to_ptr.vmem [resolvable:$true] %s2110_s2 }
  0x1c   :  { %483 = vperm.xlu0 %2569, %v47_v23   ;;  %478 = vperm.xlu1 %2570, %v46_v31   ;;  %v68_v50 = vld [vmem:[%s3812_s3 + $0x48] sm:$0xff]  ;;  %s2655_s15 = scalar_lea.vmem %s2111_s2, 32  ;;  %p2660_p1 = scmp.lt.s32.totalorder %s2111_s2, %s2111_s2 }
  0x1d   :  { %v2576_v29 = vld [vmem:[%s3810_s1 + $0x28] sm:$0xff]   ;;  %p2656_p0 = scmp.ne.s32.totalorder %s2111_s2, %s2655_s15  ;;  %p2661_p2 = scmp.lt.s32.totalorder %s2655_s15, %s2655_s15 }
  0x1e   :  { %2353 = vmatmul.mubr.msk.f32.gmra.mxu0 %vm98_vm0, %v2846_v15 }
  0x1f   :  { %2355 = vmatprep.mubr.msk.f32.mxu0 %vm98_vm0, %v2851_v16  ;;  %p2662_p3 = por %p2661_p2, %p2660_p1 }
  0x20   :  { %493 = vperm.xlu0 %2569, %v49_v24   ;;  %488 = vperm.xlu1 %2570, %v48_v33   ;;  %v92_v24 = vld [vmem:[%s3814_s5 + $0x8] sm:$0xff] }
  0x21   :  { %p2663_p4 = pnand %p2662_p3, %p2656_p0 }
  0x22   :  { %2356 = vmatmul.mubr.msk.f32.gmra.mxu0 %vm98_vm0, %v2860_v17 }
  0x23   :  { %2374 = vmatprep.mubr.bf16.mxu0 %v2571_v18 }
  0x24   :  { %503 = vperm.xlu0 %2569, %v51_v25   ;;  %498 = vperm.xlu1 %2570, %v50_v35   ;;  %v2573_v25 = vld [vmem:[%s3810_s1 + $0x8] sm:$0xff]  }
  0x28   :  { %513 = vperm.xlu0 %2569, %v53_v26   ;;  %508 = vperm.xlu1 %2570, %v52_v37   ;;  %v2574_v26 = vld [vmem:[%s3810_s1 + $0x18] sm:$0xff]  }
  0x2c   :  { %523 = vperm.xlu0 %2569, %v55_v27   ;;  %518 = vperm.xlu1 %2570, %v54_v39   ;;  %v2575_v27 = vld [vmem:[%s3810_s1 + $0x20] sm:$0xff]  }
  0x30   :  { %533 = vperm.xlu0 %2569, %v57_v28   ;;  %528 = vperm.xlu1 %2570, %v56_v41   ;;  %v91_v28 = vld [vmem:[%s3814_s5] sm:$0xff] }
  0x34   :  { %855 = vperm.xlu0 %2569, %v59_v30   ;;  %538 = vperm.xlu1 %2570, %v58_v43   ;;  %v2577_v30 = vld [vmem:[%s3810_s1 + $0x30] sm:$0xff]  }
  0x38   :  { %865 = vperm.xlu0 %2569, %v61_v32   ;;  %860 = vperm.xlu1 %2570, %v60_v47   ;;  %v3025_v32 = vld [vmem:[%s3818_s9] ss:$0 sm:$0xff] }
  0x3c   :  { %870 = vperm.xlu0 %2569, %v62_v34  }
  0x40   :  { %875 = vperm.xlu0 %2569, %v63_v36  }
  0x44   :  { %880 = vperm.xlu0 %2569, %v64_v38  }
  0x48   :  { %885 = vperm.xlu0 %2569, %v65_v40  }
  0x4c   :  { %890 = vperm.xlu0 %2569, %v66_v42  }
  0x50   :  { %895 = vperm.xlu0 %2569, %v67_v46  }
  0x54   :  { %900 = vperm.xlu0 %2569, %v68_v50  }
  0x58   :  { %905 = vperm.xlu0 %2569, %v69_v53  }
  0xc6   :  { %v2336_v44 = vpop.f32.mrf.mxu0 }
  0xc8   :  { %v213_v45 = vpop.f32.mrf.mxu0 }
  0xc9   :  { %v308_v23 = vpack.c.bf16 %v2336_v44, %v213_v45 }
  0xca   :  { %v2339_v48 = vpop.f32.mrf.mxu0 }
  0xcc   :  { %v223_v49 = vpop.f32.mrf.mxu0 }
  0xcd   :  { %v309_v22 = vpack.c.bf16 %v2339_v48, %v223_v49 }
  0xce   :  { %v2342_v51 = vpop.f32.mrf.mxu0 }
  0xd0   :  { %v233_v52 = vpop.f32.mrf.mxu0 }
  0xd1   :  { %v310_v21 = vpack.c.bf16 %v2342_v51, %v233_v52 }
  0xd2   :  { %v2345_v54 = vpop.f32.mrf.mxu0 }
  0xd4   :  { %v243_v55 = vpop.f32.mrf.mxu0 }
  0xd5   :  { %v311_v20 = vpack.c.bf16 %v2345_v54, %v243_v55 }
  0xd6   :  { %v2348_v56 = vpop.f32.mrf.mxu0 }
  0xd8   :  { %v253_v57 = vpop.f32.mrf.mxu0 }
  0xd9   :  { %v312_v19 = vpack.c.bf16 %v2348_v56, %v253_v57 }
  0xda   :  { %v2351_v58 = vpop.f32.mrf.mxu0 }
  0xdc   :  { %v263_v59 = vpop.f32.mrf.mxu0 }
  0xdd   :  { %v313_v18 = vpack.c.bf16 %v2351_v58, %v263_v59 }
  0xde   :  { %v2354_v60 = vpop.f32.mrf.mxu0 }
  0xe0   :  { %v273_v61 = vpop.f32.mrf.mxu0 }
  0xe1   :  { %v314_v1 = vpack.c.bf16 %v2354_v60, %v273_v61 }
  0xe2   :  { %v2357_v62 = vpop.f32.mrf.mxu0 }
  0xe4   :  { %v283_v63 = vpop.f32.mrf.mxu0 }
  0xe5   :  { %v315_v0 = vpack.c.bf16 %v2357_v62, %v283_v63 }
  0xe7   :  { %2358 = vmatprep.subr.bf16.mxu0 %v315_v0  ;;  %2549 = vmatprep.subr.bf16.mxu1 %v315_v0 }
  0xe8   :  { %2359 = vmatpush3.bf16.msra.mxu0 %v315_v0  ;;  %2557 = vmatpush3.bf16.msra.mxu1 %v315_v0 }
  0xe9   :  { %2360 = vmatprep.subr.bf16.mxu0 %v314_v1  ;;  %2550 = vmatprep.subr.bf16.mxu1 %v314_v1 }
  0xec   :  { %2361 = vmatpush3.bf16.msra.mxu0 %v314_v1  ;;  %2558 = vmatpush3.bf16.msra.mxu1 %v314_v1 }
  0xed   :  { %2362 = vmatprep.subr.bf16.mxu0 %v313_v18  ;;  %2551 = vmatprep.subr.bf16.mxu1 %v313_v18 }
  0xf0   :  { %2363 = vmatpush3.bf16.msra.mxu0 %v313_v18  ;;  %2559 = vmatpush3.bf16.msra.mxu1 %v313_v18 }
  0xf1   :  { %2364 = vmatprep.subr.bf16.mxu0 %v312_v19  ;;  %2552 = vmatprep.subr.bf16.mxu1 %v312_v19 }
  0xf4   :  { %2365 = vmatpush3.bf16.msra.mxu0 %v312_v19  ;;  %2560 = vmatpush3.bf16.msra.mxu1 %v312_v19 }
  0xf5   :  { %2366 = vmatprep.subr.bf16.mxu0 %v311_v20  ;;  %2553 = vmatprep.subr.bf16.mxu1 %v311_v20 }
  0xf8   :  { %2367 = vmatpush3.bf16.msra.mxu0 %v311_v20  ;;  %2561 = vmatpush3.bf16.msra.mxu1 %v311_v20 }
  0xf9   :  { %2368 = vmatprep.subr.bf16.mxu0 %v310_v21  ;;  %2554 = vmatprep.subr.bf16.mxu1 %v310_v21 }
  0xfc   :  { %2369 = vmatpush3.bf16.msra.mxu0 %v310_v21  ;;  %2562 = vmatpush3.bf16.msra.mxu1 %v310_v21 }
  0xfd   :  { %2370 = vmatprep.subr.bf16.mxu0 %v309_v22  ;;  %2555 = vmatprep.subr.bf16.mxu1 %v309_v22 }
 0x100   :  { %2371 = vmatpush3.bf16.msra.mxu0 %v309_v22  ;;  %2563 = vmatpush3.bf16.msra.mxu1 %v309_v22 }
 0x101   :  { %2372 = vmatprep.subr.bf16.mxu0 %v308_v23  ;;  %2556 = vmatprep.subr.bf16.mxu1 %v308_v23 }
 0x104   :  { %2373 = vmatpush3.bf16.msra.mxu0 %v308_v23  ;;  %2564 = vmatpush3.bf16.msra.mxu1 %v308_v23 }
 0x105   :  { %2390 = vmatprep.subr.mxu0 %v92_v24 }
 0x107   :  { %2375 = vmatmul.mubr.bf16.vlgmr.msra.gmra.mxu0 %v2573_v25  ;;  %2379 = vmatmul.mubr.bf16.vlgmr.msra.gmra.mxu1 %v2574_v26 }
 0x108   :  { %2391 = vmatpush3.msra.mxu0 %v92_v24  ;;  %2382 = vmatprep.mubr.bf16.mxu1 %v2575_v27 }
 0x109   :  { %2392 = vmatprep.subr.mxu0 %v91_v28  ;;  %2394 = vmatprep.mubr.msk.f32.mxu0 %vm98_vm0, %v2755_v2  ;;  %v2578_v2 = vld [vmem:[%s3810_s1 + $0x38] sm:$0xff]  }
 0x10a   :  { %2393 = vmatpush3.msra.mxu0 %v91_v28 }
 0x10f   :  { %2383 = vmatmul.mubr.bf16.gmra.mxu1 %v2576_v29  ;;  %2395 = vmatmul.mubr.msk.f32.vlgmr.msra.gmra.mxu0 %vm98_vm0, %v2762_v3  ;;  %v3007_v3 = vpop.permute.xlu1 %473 }
 0x110   :  { %2397 = vmatprep.mubr.msk.f32.mxu0 %vm98_vm0, %v2767_v4  ;;  %2386 = vmatprep.mubr.bf16.mxu1 %v2577_v30  ;;  %v3009_v4 = vpop.permute.xlu0 %463 }
 0x113   :  { %2398 = vmatmul.mubr.msk.f32.gmra.mxu0 %vm98_vm0, %v2774_v5  ;;  %v3011_v5 = vpop.permute.xlu1 %478 }
 0x114   :  { %2400 = vmatprep.mubr.msk.f32.mxu0 %vm98_vm0, %v2779_v6  ;;  %v3013_v6 = vpop.permute.xlu0 %468 }
 0x117   :  { %2387 = vmatmul.mubr.bf16.gmra.mxu1 %v2578_v2  ;;  %2401 = vmatmul.mubr.msk.f32.gmra.mxu0 %vm98_vm0, %v2786_v7 }
 0x118   :  { %2403 = vmatprep.mubr.msk.f32.mxu0 %vm98_vm0, %v2793_v8 }
 0x11b   :  { %2404 = vmatmul.mubr.msk.f32.gmra.mxu0 %vm98_vm0, %v2800_v9 }
 0x11c   :  { %2406 = vmatprep.mubr.msk.f32.mxu0 %vm98_vm0, %v2807_v10 }
 0x11f   :  { %2407 = vmatmul.mubr.msk.f32.gmra.mxu0 %vm98_vm0, %v2818_v11  ;;  %v3015_v11 = vpop.permute.xlu1 %488 }
 0x120   :  { %2409 = vmatprep.mubr.msk.f32.mxu0 %vm98_vm0, %v2823_v12 }
 0x123   :  { %2410 = vmatmul.mubr.msk.f32.gmra.mxu0 %vm98_vm0, %v2832_v13  ;;  %v3027_v34 = vpop.permute.xlu1 %498 }
 0x124   :  { %2412 = vmatprep.mubr.msk.f32.mxu0 %vm98_vm0, %v2837_v14  ;;  %v3017_v14 = vpop.permute.xlu0 %483 }
 0x127   :  { %2413 = vmatmul.mubr.msk.f32.gmra.mxu0 %vm98_vm0, %v2846_v15  ;;  %v3046_v54 = vpop.permute.xlu1 %508 }
 0x128   :  { %2415 = vmatprep.mubr.msk.f32.mxu0 %vm98_vm0, %v2851_v16  ;;  %v3030_v39 = vpop.permute.xlu0 %493 }
 0x12b   :  { %2416 = vmatmul.mubr.msk.f32.gmra.mxu0 %vm98_vm0, %v2860_v17  ;;  %v3067_v24 = vpop.permute.xlu1 %518 }
 0x12c   :  { %v3054_v60 = vpop.permute.xlu0 %503 }
 0x1c7   :  { %v2376_v7 = vpop.f32.mrf.mxu0  ;;  %v2380_v8 = vpop.f32.mrf.mxu1 }
 0x1c8   :  { %v543_v45 = vmul.f32 %v2376_v7, %v3007_v3  ;;  %v547_v21 = vmul.f32 %v2380_v8, %v3030_v39  ;;  %v3077_v7 = vpop.permute.xlu0 %513 }
 0x1c9   :  { %v398_v9 = vpop.f32.mrf.mxu0  ;;  %v414_v10 = vpop.f32.mrf.mxu1 }
 0x1ca   :  { %v541_v35 = vmul.f32 %v3009_v4, %v398_v9  ;;  %v545_v58 = vmul.f32 %v3017_v14, %v414_v10 }
 0x1cb   :  { %v2377_v12 = vpop.f32.mrf.mxu0  ;;  %v2381_v13 = vpop.f32.mrf.mxu1 }
 0x1cc   :  { %v544_v40 = vmul.f32 %v2377_v12, %v3011_v5  ;;  %v548_v19 = vmul.f32 %v2381_v13, %v3027_v34 }
 0x1cd   :  { %v401_v15 = vpop.f32.mrf.mxu0  ;;  %v417_v16 = vpop.f32.mrf.mxu1 }
 0x1ce   :  { %v542_v17 = vmul.f32 %v3013_v6, %v401_v15  ;;  %v546_v55 = vmul.f32 %v3015_v11, %v417_v16 }
 0x1cf   :  { %v3020_v31 = vpop.f32.mrf.mxu1  ;;  %v2396_v33 = vpop.f32.mrf.mxu0 }
 0x1d0   :  { %v629_v36 = vadd.f32 %v2396_v33, %v542_v17 }
 0x1d1   :  { %v430_v37 = vpop.f32.mrf.mxu1  ;;  %v623_v38 = vpop.f32.mrf.mxu0 }
 0x1d2   :  { %v3034_v41 = vadd.f32 %v3025_v32, %v629_v36  ;;  %v624_v42 = vadd.f32 %v623_v38, %v541_v35  ;;  %v549_v10 = vmul.f32 %v3054_v60, %v430_v37 }
 0x1d3   :  { %v2385_v43 = vpop.f32.mrf.mxu1  ;;  %v2399_v44 = vpop.f32.mrf.mxu0 }
 0x1d4   :  { %v3038_v46 = vadd.f32 %v3025_v32, %v624_v42  ;;  %v639_v47 = vadd.f32 %v2399_v44, %v544_v40  ;;  %v725_v48 = vmul.f32 %v3034_v41, %v3034_v41  ;;  %v3093_v40 = vpop.permute.xlu1 %528  ;;  %v552_v42 = vmul.f32 %v2385_v43, %v3067_v24 }
 0x1d5   :  { %v433_v49 = vpop.f32.mrf.mxu1  ;;  %v633_v50 = vpop.f32.mrf.mxu0 }
 0x1d6   :  { %v3043_v51 = vadd.f32 %v3025_v32, %v639_v47  ;;  %v634_v52 = vadd.f32 %v633_v50, %v543_v45  ;;  %v744_v53 = vsel %vm740_vm1, %v725_v48, 0.0  ;;  %v724_v57 = vmul.f32 %v3038_v46, %v3038_v46  ;;  %v3102_v50 = vpop.permute.xlu0 %523 }
 0x1d7   :  { %v2402_v56 = vpop.f32.mrf.mxu0  ;;  %745 = vadd.xlane.f32.xlu1 %v744_v53  ;;  %v3052_v59 = vpop.f32.mrf.mxu1  ;;  %v550_v8 = vmul.f32 %v3046_v54, %v433_v49  ;;  %v551_v45 = vmul.f32 %v3020_v31, %v3077_v7 }
 0x1d8   :  { %v3057_v61 = vadd.f32 %v3025_v32, %v634_v52  ;;  %v649_v62 = vadd.f32 %v2402_v56, %v546_v55  ;;  %v741_v0 = vsel %vm740_vm1, %v724_v57, 0.0  ;;  %v727_v1 = vmul.f32 %v3043_v51, %v3043_v51 }
 0x1d9   :  { %v643_v63 = vpop.f32.mrf.mxu0  ;;  %742 = vadd.xlane.f32.xlu0 %v741_v0  ;;  %v446_v22 = vpop.f32.mrf.mxu1 }
 0x1da   :  { %v644_v18 = vadd.f32 %v643_v63, %v545_v58  ;;  %v3070_v25 = vadd.f32 %v3025_v32, %v649_v62  ;;  %v750_v28 = vsel %vm740_vm1, %v727_v1, 0.0  ;;  %v726_v29 = vmul.f32 %v3057_v61, %v3057_v61 }
 0x1db   :  { %v2405_v20 = vpop.f32.mrf.mxu0  ;;  %v2389_v12 = vpop.f32.mrf.mxu1  ;;  %v553_v63 = vmul.f32 %v3102_v50, %v446_v22 }
 0x1dc   :  { %v3065_v23 = vadd.f32 %v3025_v32, %v644_v18  ;;  %v659_v26 = vadd.f32 %v2405_v20, %v548_v19  ;;  %v747_v35 = vsel %vm740_vm1, %v726_v29, 0.0  ;;  %v729_v36 = vmul.f32 %v3070_v25, %v3070_v25  ;;  %v3118_v18 = vpop.permute.xlu1 %538 }
 0x1dd   :  { %v653_v27 = vpop.f32.mrf.mxu0  ;;  %751 = vadd.xlane.f32.xlu0 %v750_v28  ;;  %v449_v47 = vpop.f32.mrf.mxu1  ;;  %v556_v22 = vmul.f32 %v2389_v12, %v3118_v18 }
 0x1de   :  { %v654_v30 = vadd.f32 %v653_v27, %v547_v21  ;;  %v728_v2 = vmul.f32 %v3065_v23, %v3065_v23  ;;  %v3086_v16 = vadd.f32 %v3025_v32, %v659_v26  ;;  %v756_v56 = vsel %vm740_vm1, %v729_v36, 0.0 }
 0x1df   :  { %v2408_v9 = vpop.f32.mrf.mxu0  ;;  %v554_v58 = vmul.f32 %v3093_v40, %v449_v47 }
 0x1e0   :  { %v3082_v13 = vadd.f32 %v3025_v32, %v654_v30  ;;  %v753_v15 = vsel %vm740_vm1, %v728_v2, 0.0  ;;  %v669_v17 = vadd.f32 %v2408_v9, %v550_v8  ;;  %v731_v43 = vmul.f32 %v3086_v16, %v3086_v16  ;;  %v3129_v30 = vpop.permute.xlu0 %533 }
 0x1e1   :  { %v663_v33 = vpop.f32.mrf.mxu0  ;;  %754 = vadd.xlane.f32.xlu1 %v753_v15  ;;  %748 = vadd.xlane.f32.xlu0 %v747_v35  ;;  %v555_v8 = vmul.f32 %v3052_v59, %v3129_v30 }
 0x1e2   :  { %v664_v38 = vadd.f32 %v663_v33, %v549_v10  ;;  %v730_v37 = vmul.f32 %v3082_v13, %v3082_v13  ;;  %v3105_v52 = vadd.f32 %v3025_v32, %v669_v17  ;;  %v762_v26 = vsel %vm740_vm1, %v731_v43, 0.0  ;;  %v71_v43 = vld [vmem:[%s3812_s3 + $0x60] sm:$0xff] }
 0x1e3   :  { %v2411_v44 = vpop.f32.mrf.mxu0 }
 0x1e4   :  { %v3099_v48 = vadd.f32 %v3025_v32, %v664_v38  ;;  %v759_v49 = vsel %vm740_vm1, %v730_v37, 0.0  ;;  %v679_v53 = vadd.f32 %v2411_v44, %v552_v42  ;;  %v733_v27 = vmul.f32 %v3105_v52, %v3105_v52 }
 0x1e5   :  { %v673_v55 = vpop.f32.mrf.mxu0  ;;  %760 = vadd.xlane.f32.xlu1 %v759_v49  ;;  %757 = vadd.xlane.f32.xlu0 %v756_v56  ;;  %v70_v56 = vld [vmem:[%s3812_s3 + $0x58] sm:$0xff] }
 0x1e6   :  { %v674_v31 = vadd.f32 %v673_v55, %v551_v45  ;;  %v732_v57 = vmul.f32 %v3099_v48, %v3099_v48  ;;  %v3121_v19 = vadd.f32 %v3025_v32, %v679_v53  ;;  %v768_v33 = vsel %vm740_vm1, %v733_v27, 0.0  ;;  %v1146_v27 = vld [vmem:[%s3817_s8 + $0x18] sm:$0xff] }
 0x1e7   :  { %v2414_v62 = vpop.f32.mrf.mxu0  ;;  %2418 = vmatprep.subr.mxu1 %v1146_v27 }
 0x1e8   :  { %v3115_v0 = vadd.f32 %v3025_v32, %v674_v31  ;;  %v765_v1 = vsel %vm740_vm1, %v732_v57, 0.0  ;;  %v689_v20 = vadd.f32 %v2414_v62, %v554_v58  ;;  %v735_v35 = vmul.f32 %v3121_v19, %v3121_v19  ;;  %v72_v31 = vld [vmem:[%s3812_s3 + $0x68] sm:$0xff]  ;;  %v73_v57 = vld [vmem:[%s3812_s3 + $0x70] sm:$0xff]  ;;  %v74_v58 = vld [vmem:[%s3812_s3 + $0x78] sm:$0xff]  ;;  %v3177_v62 = vpop.permute.xlu0 %855  ;;  %2419 = vmatpush3.msra.mxu1 %v1146_v27 }
 0x1e9   :  { %v683_v21 = vpop.f32.mrf.mxu0  ;;  %766 = vadd.xlane.f32.xlu1 %v765_v1  ;;  %763 = vadd.xlane.f32.xlu0 %v762_v26 }
 0x1ea   :  { %v684_v28 = vadd.f32 %v683_v21, %v553_v63  ;;  %v734_v29 = vmul.f32 %v3115_v0, %v3115_v0  ;;  %v3138_v17 = vadd.f32 %v3025_v32, %v689_v20  ;;  %v774_v45 = vsel %vm740_vm1, %v735_v35, 0.0 }
 0x1eb   :  { %v2417_v2 = vpop.f32.mrf.mxu0 }
 0x1ec   :  { %v3134_v9 = vadd.f32 %v3025_v32, %v684_v28  ;;  %v699_v10 = vadd.f32 %v2417_v2, %v556_v22  ;;  %v771_v15 = vsel %vm740_vm1, %v734_v29, 0.0  ;;  %v737_v47 = vmul.f32 %v3138_v17, %v3138_v17  ;;  %v3179_v63 = vpop.permute.xlu0 %865  ;;  %v1145_v22 = vld [vmem:[%s3817_s8 + $0x10] sm:$0xff]  ;;  %v1144_v28 = vld [vmem:[%s3817_s8 + $0x8] sm:$0xff]  ;;  %v1143_v2 = vld [vmem:[%s3817_s8] sm:$0xff] }
 0x1ed   :  { %v693_v12 = vpop.f32.mrf.mxu0  ;;  %772 = vadd.xlane.f32.xlu1 %v771_v15  ;;  %769 = vadd.xlane.f32.xlu0 %v768_v33  ;;  %3830 = vst [vmem:[#allocation6_spill] sm:$0xff] %v3179_v63  ;;  %v3207_v15 = vpop.permute.xlu1 %860 }
 0x1ee   :  { %v3144_v36 = vadd.f32 %v3025_v32, %v699_v10  ;;  %v694_v59 = vadd.f32 %v693_v12, %v555_v8  ;;  %v736_v38 = vmul.f32 %v3134_v9, %v3134_v9  ;;  %2420 = vmatprep.subr.mxu1 %v1145_v22 }
 0x1ef   :  { %2421 = vmatpush3.msra.mxu1 %v1145_v22 }
 0x1f0   :  { %v3149_v37 = vadd.f32 %v3025_v32, %v694_v59  ;;  %v777_v42 = vsel %vm740_vm1, %v736_v38, 0.0  ;;  %v739_v44 = vmul.f32 %v3144_v36, %v3144_v36  ;;  %v780_v32 = vsel %vm740_vm1, %v737_v47, 0.0  ;;  %v3181_v1 = vpop.permute.xlu0 %870  ;;  %2422 = vmatprep.subr.mxu1 %v1144_v28 }
 0x1f1   :  { %778 = vadd.xlane.f32.xlu1 %v777_v42  ;;  %775 = vadd.xlane.f32.xlu0 %v774_v45 }
 0x1f2   :  { %v786_v49 = vsel %vm740_vm1, %v739_v44, 0.0  ;;  %v738_v53 = vmul.f32 %v3149_v37, %v3149_v37  ;;  %2423 = vmatpush3.msra.mxu1 %v1144_v28 }
 0x1f3   :  { %2424 = vmatprep.subr.mxu1 %v1143_v2 }
 0x1f4   :  { %v783_v55 = vsel %vm740_vm1, %v738_v53, 0.0  ;;  %v3183_v20 = vpop.permute.xlu0 %875  ;;  %2425 = vmatpush3.msra.mxu1 %v1143_v2  ;;  %v3214_v53 = vld [vmem:[%s3816_s7 + $0x18] sm:$0xff] }
 0x1f5   :  { %787 = vadd.xlane.f32.xlu1 %v786_v49  ;;  %781 = vadd.xlane.f32.xlu0 %v780_v32  ;;  %3831 = vst [vmem:[#allocation7_spill] sm:$0xff] %v3183_v20 }
 0x1f6   :  { %2482 = vmatprep.subr.mxu1 %v3214_v53 }
 0x1f8   :  { %v3185_v21 = vpop.permute.xlu0 %880 }
 0x1f9   :  { %784 = vadd.xlane.f32.xlu1 %v783_v55 }
 0x1fc   :  { %v3187_v26 = vpop.permute.xlu0 %885 }
 0x200   :  { %v3198_v29 = vpop.permute.xlu0 %890 }
 0x204   :  { %v3203_v8 = vpop.permute.xlu0 %895 }
 0x208   :  { %v3205_v10 = vpop.permute.xlu0 %900 }
 0x20a   :  { %910 = vperm.xlu1 %2570, %v70_v56  }
 0x20b   :  { %915 = vperm.xlu0 %2569, %v71_v43  }
 0x20c   :  { %v3209_v12 = vpop.permute.xlu0 %905 }
 0x20f   :  { %920 = vperm.xlu0 %2569, %v72_v31  }
 0x213   :  { %925 = vperm.xlu0 %2569, %v73_v57  }
 0x217   :  { %930 = vperm.xlu0 %2569, %v74_v58  }
 0x260   :  { %v746_v33 = vpop.xlane.xlu1 %745 }
 0x261   :  { %v790_v35 = vmax.f32 %v746_v33, 1e-24 }
 0x262   :  { %v743_v59 = vpop.xlane.xlu0 %742 }
 0x263   :  { %2587 = vrsqrt.f32 %v790_v35  ;;  %v789_v38 = vmax.f32 %v743_v59, 1e-24 }
 0x265   :  { %2589 = vrsqrt.f32 %v789_v38 }
 0x266   :  { %v752_v42 = vpop.xlane.xlu0 %751 }
 0x267   :  { %v792_v44 = vmax.f32 %v752_v42, 1e-24 }
 0x269   :  { %2591 = vrsqrt.f32 %v792_v44 }
 0x26a   :  { %v755_v45 = vpop.xlane.xlu1 %754  ;;  %v749_v49 = vpop.xlane.xlu0 %748 }
 0x26b   :  { %v793_v47 = vmax.f32 %v755_v45, 1e-24  ;;  %v791_v32 = vmax.f32 %v749_v49, 1e-24 }
 0x26d   :  { %2593 = vrsqrt.f32 %v793_v47 }
 0x26e   :  { %2595 = vrsqrt.f32 %v791_v32  ;;  %v761_v55 = vpop.xlane.xlu1 %760  ;;  %v758_v43 = vpop.xlane.xlu0 %757 }
 0x26f   :  { %v795_v56 = vmax.f32 %v761_v55, 1e-24  ;;  %v794_v57 = vmax.f32 %v758_v43, 1e-24 }
 0x270   :  { %v2588_v31 = vpop.eup %2587 }
 0x271   :  { %v822_v58 = vmul.f32 %v2588_v31, %v3034_v41  ;;  %2597 = vrsqrt.f32 %v795_v56 }
 0x272   :  { %2599 = vrsqrt.f32 %v794_v57  ;;  %v767_v27 = vpop.xlane.xlu1 %766  ;;  %v2590_v22 = vpop.eup %2589 }
 0x273   :  { %v838_v28 = vmax.f32 %v822_v58, 0.0  ;;  %v797_v2 = vmax.f32 %v767_v27, 1e-24  ;;  %v764_v33 = vpop.xlane.xlu0 %763  ;;  %v821_v35 = vmul.f32 %v2590_v22, %v3038_v46 }
 0x274   :  { %v796_v59 = vmax.f32 %v764_v33, 1e-24 }
 0x275   :  { %2601 = vrsqrt.f32 %v797_v2  ;;  %v837_v38 = vmax.f32 %v821_v35, 0.0  ;;  %v3220_v45 = vmul.f32 %v3207_v15, %v838_v28 }
 0x276   :  { %2603 = vrsqrt.f32 %v796_v59  ;;  %v773_v42 = vpop.xlane.xlu1 %772  ;;  %v2592_v44 = vpop.eup %2591 }
 0x277   :  { %v799_v47 = vmax.f32 %v773_v42, 1e-24  ;;  %v770_v41 = vpop.xlane.xlu0 %769  ;;  %v3223_v49 = vmul.f32 %v3177_v62, %v837_v38  ;;  %v824_v32 = vmul.f32 %v2592_v44, %v3043_v51  ;;  %v989_v58 = vmul.f32 %v3220_v45, %v3220_v45 }
 0x278   :  { %v798_v55 = vmax.f32 %v770_v41, 1e-24  ;;  %v950_v42 = vsel %vm740_vm1, %v3220_v45, 0.0 }
 0x279   :  { %2605 = vrsqrt.f32 %v799_v47  ;;  %v988_v46 = vmul.f32 %v3223_v49, %v3223_v49  ;;  %v840_v43 = vmax.f32 %v824_v32, 0.0  ;;  %v949_v33 = vsel %vm740_vm1, %v3223_v49, 0.0 }
 0x27a   :  { %v2594_v56 = vpop.eup %2593  ;;  %2607 = vrsqrt.f32 %v798_v55  ;;  %v779_v31 = vpop.xlane.xlu1 %778 }
 0x27b   :  { %v2596_v57 = vpop.eup %2595  ;;  %v825_v27 = vmul.f32 %v2594_v56, %v3065_v23  ;;  %v801_v22 = vmax.f32 %v779_v31, 1e-24  ;;  %v776_v28 = vpop.xlane.xlu0 %775  ;;  %v3235_v35 = vmul.f32 %v3181_v1, %v840_v43  ;;  %v1004_v44 = vsel %vm740_vm1, %v988_v46, 0.0 }
 0x27c   :  { %v823_v2 = vmul.f32 %v2596_v57, %v3057_v61  ;;  %v800_v51 = vmax.f32 %v776_v28, 1e-24  ;;  %v1005_v61 = vsel %vm740_vm1, %v989_v58, 0.0  ;;  %v951_v31 = vadd.f32 %v950_v42, %v949_v33 }
 0x27d   :  { %v841_v59 = vmax.f32 %v825_v27, 0.0  ;;  %2609 = vrsqrt.f32 %v801_v22  ;;  %v1006_v22 = vadd.f32 %v1005_v61, %v1004_v44  ;;  %v991_v28 = vmul.f32 %v3235_v35, %v3235_v35 }
 0x27e   :  { %v2598_v38 = vpop.eup %2597  ;;  %v839_v23 = vmax.f32 %v823_v2, 0.0  ;;  %2611 = vrsqrt.f32 %v800_v51  ;;  %v788_v47 = vpop.xlane.xlu1 %787 }
 0x27f   :  { %v2600_v41 = vpop.eup %2599  ;;  %v3242_v32 = vmul.f32 %v3183_v20, %v841_v59  ;;  %v827_v55 = vmul.f32 %v2598_v38, %v3082_v13  ;;  %v804_v56 = vmax.f32 %v788_v47, 1e-24  ;;  %v782_v43 = vpop.xlane.xlu0 %781 }
 0x280   :  { %v3246_v57 = vmul.f32 %v3179_v63, %v839_v23  ;;  %v826_v27 = vmul.f32 %v2600_v41, %v3070_v25  ;;  %v802_v46 = vmax.f32 %v782_v43, 1e-24  ;;  %v954_v25 = vsel %vm740_vm1, %v3235_v35, 0.0 }
 0x281   :  { %v843_v2 = vmax.f32 %v827_v55, 0.0  ;;  %2613 = vrsqrt.f32 %v804_v56  ;;  %v992_v42 = vmul.f32 %v3242_v32, %v3242_v32  ;;  %v1009_v63 = vsel %vm740_vm1, %v991_v28, 0.0 }
 0x282   :  { %v2602_v58 = vpop.eup %2601  ;;  %v952_v51 = vsel %vm740_vm1, %v3246_v57, 0.0  ;;  %v990_v13 = vmul.f32 %v3246_v57, %v3246_v57  ;;  %v842_v33 = vmax.f32 %v826_v27, 0.0  ;;  %2615 = vrsqrt.f32 %v802_v46  ;;  %v785_v59 = vpop.xlane.xlu1 %784 }
 0x283   :  { %v2604_v38 = vpop.eup %2603  ;;  %v953_v44 = vadd.f32 %v952_v51, %v951_v31  ;;  %v829_v23 = vmul.f32 %v2602_v58, %v3099_v48  ;;  %v803_v55 = vmax.f32 %v785_v59, 1e-24  ;;  %v3266_v43 = vmul.f32 %v3187_v26, %v843_v2 }
 0x284   :  { %v1007_v47 = vsel %vm740_vm1, %v990_v13, 0.0  ;;  %v3262_v41 = vmul.f32 %v3185_v21, %v842_v33  ;;  %v828_v61 = vmul.f32 %v2604_v38, %v3086_v16  ;;  %v956_v48 = vsel %vm740_vm1, %v3242_v32, 0.0 }
 0x285   :  { %v1008_v56 = vadd.f32 %v1007_v47, %v1006_v22  ;;  %v845_v27 = vmax.f32 %v829_v23, 0.0  ;;  %v955_v46 = vadd.f32 %v954_v25, %v953_v44  ;;  %2617 = vrsqrt.f32 %v803_v55 }
 0x286   :  { %v2606_v20 = vpop.eup %2605  ;;  %v844_v31 = vmax.f32 %v828_v61, 0.0  ;;  %v993_v51 = vmul.f32 %v3262_v41, %v3262_v41  ;;  %v3277_v13 = vpop.permute.xlu0 %915  ;;  %v958_v59 = vsel %vm740_vm1, %v3262_v41, 0.0  ;;  %v1011_v25 = vsel %vm740_vm1, %v992_v42, 0.0 }
 0x287   :  { %v2608_v58 = vpop.eup %2607  ;;  %v3274_v16 = vmul.f32 %v3203_v8, %v845_v27  ;;  %v831_v22 = vmul.f32 %v2606_v20, %v3115_v0  ;;  %v957_v2 = vadd.f32 %v956_v48, %v955_v46  ;;  %3832 = vst [vmem:[#allocation8_spill] sm:$0xff] %v3277_v13  ;;  %v1010_v38 = vadd.f32 %v1009_v63, %v1008_v56 }
 0x288   :  { %v3280_v33 = vmul.f32 %v3198_v29, %v844_v31  ;;  %v830_v28 = vmul.f32 %v2608_v58, %v3105_v52  ;;  %v994_v44 = vmul.f32 %v3266_v43, %v3266_v43  ;;  %v960_v61 = vsel %vm740_vm1, %v3266_v43, 0.0 }
 0x289   :  { %v847_v23 = vmax.f32 %v831_v22, 0.0  ;;  %v959_v47 = vadd.f32 %v958_v59, %v957_v2  ;;  %v1012_v52 = vadd.f32 %v1011_v25, %v1010_v38  ;;  %v996_v63 = vmul.f32 %v3274_v16, %v3274_v16 }
 0x28a   :  { %v2610_v0 = vpop.eup %2609  ;;  %v846_v20 = vmax.f32 %v830_v28, 0.0  ;;  %v995_v55 = vmul.f32 %v3280_v33, %v3280_v33  ;;  %v1013_v42 = vsel %vm740_vm1, %v993_v51, 0.0  ;;  %v3295_v56 = vpop.permute.xlu0 %920  ;;  %v962_v58 = vsel %vm740_vm1, %v3280_v33, 0.0 }
 0x28b   :  { %v2612_v27 = vpop.eup %2611  ;;  %v961_v46 = vadd.f32 %v960_v61, %v959_v47  ;;  %3833 = vst [vmem:[#allocation9_spill] sm:$0xff] %v3295_v56  ;;  %v1014_v22 = vadd.f32 %v1013_v42, %v1012_v52  ;;  %v3304_v2 = vmul.f32 %v3209_v12, %v847_v23  ;;  %v1015_v59 = vsel %vm740_vm1, %v994_v44, 0.0 }
 0x28c   :  { %v832_v48 = vmul.f32 %v2612_v27, %v3121_v19  ;;  %v3299_v31 = vmul.f32 %v3205_v10, %v846_v20  ;;  %v833_v38 = vmul.f32 %v2610_v0, %v3134_v9  ;;  %v964_v19 = vsel %vm740_vm1, %v3274_v16, 0.0  ;;  %v3311_v27 = vpop.permute.xlu1 %910 }
 0x28d   :  { %v963_v28 = vadd.f32 %v962_v58, %v961_v46  ;;  %v1016_v47 = vadd.f32 %v1015_v59, %v1014_v22  ;;  %v1017_v20 = vsel %vm740_vm1, %v995_v55, 0.0  ;;  %3834 = vst [vmem:[#allocation10_spill] sm:$0xff] %v3311_v27  ;;  %v998_v22 = vmul.f32 %v3304_v2, %v3304_v2 }
 0x28e   :  { %v2614_v51 = vpop.eup %2613  ;;  %v848_v25 = vmax.f32 %v832_v48, 0.0  ;;  %v997_v23 = vmul.f32 %v3299_v31, %v3299_v31  ;;  %v849_v46 = vmax.f32 %v833_v38, 0.0  ;;  %v3315_v42 = vpop.permute.xlu0 %925  ;;  %v966_v0 = vsel %vm740_vm1, %v3299_v31, 0.0 }
 0x28f   :  { %v2616_v61 = vpop.eup %2615  ;;  %v965_v52 = vadd.f32 %v964_v19, %v963_v28  ;;  %3835 = vst [vmem:[#allocation11_spill] sm:$0xff] %v3315_v42  ;;  %v836_v9 = vmul.f32 %v2614_v51, %v3144_v36  ;;  %v1018_v48 = vadd.f32 %v1017_v20, %v1016_v47  ;;  %v1019_v28 = vsel %vm740_vm1, %v996_v63, 0.0 }
 0x290   :  { %v3319_v44 = vmul.f32 %v3311_v27, %v848_v25  ;;  %v834_v55 = vmul.f32 %v2616_v61, %v3138_v17  ;;  %v3328_v59 = vmul.f32 %v3277_v13, %v849_v46  ;;  %v968_v36 = vsel %vm740_vm1, %v3304_v2, 0.0 }
 0x291   :  { %v967_v58 = vadd.f32 %v966_v0, %v965_v52  ;;  %v1020_v38 = vadd.f32 %v1019_v28, %v1018_v48  ;;  %v1021_v17 = vsel %vm740_vm1, %v997_v23, 0.0  ;;  %v852_v20 = vmax.f32 %v836_v9, 0.0 }
 0x292   :  { %v850_v51 = vmax.f32 %v834_v55, 0.0  ;;  %v2618_v25 = vpop.eup %2617  ;;  %v999_v47 = vmul.f32 %v3319_v44, %v3319_v44  ;;  %v970_v61 = vsel %vm740_vm1, %v3319_v44, 0.0  ;;  %v3341_v0 = vpop.permute.xlu0 %930  ;;  %v1023_v55 = vsel %vm740_vm1, %v998_v22, 0.0 }
 0x293   :  { %v969_v19 = vadd.f32 %v968_v36, %v967_v58  ;;  %v1022_v63 = vadd.f32 %v1021_v17, %v1020_v38  ;;  %v835_v46 = vmul.f32 %v2618_v25, %v3149_v37  ;;  %3836 = vst [vmem:[#allocation12_spill] sm:$0xff] %v3341_v0  ;;  %v1000_v58 = vmul.f32 %v3328_v59, %v3328_v59 }
 0x294   :  { %v3338_v52 = vmul.f32 %v3295_v56, %v850_v51  ;;  %v972_v23 = vsel %vm740_vm1, %v3328_v59, 0.0  ;;  %v1025_v36 = vsel %vm740_vm1, %v999_v47, 0.0  ;;  %v948_v37 = vmul.f32 %v3341_v0, %v852_v20 }
 0x295   :  { %v971_v48 = vadd.f32 %v970_v61, %v969_v19  ;;  %v1024_v28 = vadd.f32 %v1023_v55, %v1022_v63  ;;  %v851_v9 = vmax.f32 %v835_v46, 0.0  ;;  %v1027_v17 = vsel %vm740_vm1, %v1000_v58, 0.0 }
 0x296   :  { %v1001_v51 = vmul.f32 %v3338_v52, %v3338_v52  ;;  %v974_v22 = vsel %vm740_vm1, %v3338_v52, 0.0  ;;  %v1003_v55 = vmul.f32 %v948_v37, %v948_v37 }
 0x297   :  { %v973_v38 = vadd.f32 %v972_v23, %v971_v48  ;;  %v1026_v25 = vadd.f32 %v1025_v36, %v1024_v28  ;;  %v3355_v19 = vmul.f32 %v3315_v42, %v851_v9  ;;  %v978_v9 = vsel %vm740_vm1, %v948_v37, 0.0 }
 0x298   :  { %v1029_v48 = vsel %vm740_vm1, %v1001_v51, 0.0 }
 0x299   :  { %v975_v61 = vadd.f32 %v974_v22, %v973_v38  ;;  %v1028_v63 = vadd.f32 %v1027_v17, %v1026_v25  ;;  %v976_v47 = vsel %vm740_vm1, %v3355_v19, 0.0  ;;  %v1002_v46 = vmul.f32 %v3355_v19, %v3355_v19 }
 0x29a   :  { %v1033_v38 = vsel %vm740_vm1, %v1003_v55, 0.0 }
 0x29b   :  { %v977_v20 = vadd.f32 %v976_v47, %v975_v61  ;;  %v1030_v28 = vadd.f32 %v1029_v48, %v1028_v63  ;;  %v1031_v23 = vsel %vm740_vm1, %v1002_v46, 0.0 }
 0x29d   :  { %v979_v36 = vadd.f32 %v978_v9, %v977_v20  ;;  %v1032_v0 = vadd.f32 %v1031_v23, %v1030_v28 }
 0x29f   :  { %v980_v58 = vrot.slane %v979_v36, 4  ;;  %v1034_v25 = vadd.f32 %v1033_v38, %v1032_v0  ;;  %v1064_v0 = vlaneseq }
 0x2a1   :  { %v981_v22 = vadd.f32 %v980_v58, %v979_v36  ;;  %v1035_v17 = vrot.slane %v1034_v25, 4  ;;  %v3370_v9 = vshrl.u32 %v1064_v0, 7 }
 0x2a3   :  { %v982_v42 = vrot.slane %v981_v22, 2  ;;  %v1036_v13 = vadd.f32 %v1035_v17, %v1034_v25 }
 0x2a5   :  { %v983_v56 = vadd.f32 %v982_v42, %v981_v22  ;;  %v1037_v27 = vrot.slane %v1036_v13, 2  ;;  %v96_v42 = vld [vmem:[%s3819_s10] sm:$0x1] }
 0x2a7   :  { %v984_v51 = vrot.slane %v983_v56, 1  ;;  %v1038_v61 = vadd.f32 %v1037_v27, %v1036_v13  ;;  %v3829_v13 = vsub.s32 0, %v3370_v9 }
 0x2a9   :  { %v985_v47 = vadd.f32 %v984_v51, %v983_v56  ;;  %v1039_v63 = vrot.slane %v1038_v61, 1 }
 0x2ab   :  { %v3366_v48 = vmul.f32 0.0078125, %v985_v47  ;;  %v1040_v46 = vadd.f32 %v1039_v63, %v1038_v61 }
 0x2ad   :  { %v1042_v20 = vmul.f32 %v3366_v48, %v3366_v48  ;;  %v1041_v28 = vmul.f32 0.0078125, %v1040_v46  ;;  %v1062_v27 = vsub.f32 %v948_v37, %v3366_v48  ;;  %v1047_v36 = vsub.f32 %v3223_v49, %v3366_v48 }
 0x2ae   :  { %v1048_v38 = vsub.f32 %v3220_v45, %v3366_v48  ;;  %v1049_v25 = vsub.f32 %v3246_v57, %v3366_v48  ;;  %v1050_v22 = vsub.f32 %v3235_v35, %v3366_v48  ;;  %v1051_v17 = vsub.f32 %v3242_v32, %v3366_v48 }
 0x2af   :  { %v1043_v23 = vsub.f32 %v1041_v28, %v1042_v20  ;;  %v1052_v51 = vsub.f32 %v3262_v41, %v3366_v48  ;;  %v1053_v37 = vsub.f32 %v3266_v43, %v3366_v48  ;;  %v1054_v49 = vsub.f32 %v3280_v33, %v3366_v48  ;;  %v2159_v41 = vld [vmem:[%s3820_s11] ss:$0 sm:$0xff] }
 0x2b0   :  { %v1055_v57 = vsub.f32 %v3274_v16, %v3366_v48  ;;  %v1056_v35 = vsub.f32 %v3299_v31, %v3366_v48  ;;  %v1057_v32 = vsub.f32 %v3304_v2, %v3366_v48  ;;  %v1058_v43 = vsub.f32 %v3319_v44, %v3366_v48 }
 0x2b1   :  { %v1044_v55 = vadd.f32 1e-05, %v1043_v23  ;;  %v1059_v33 = vsub.f32 %v3328_v59, %v3366_v48  ;;  %v1060_v61 = vsub.f32 %v3338_v52, %v3366_v48  ;;  %v1061_v16 = vsub.f32 %v3355_v19, %v3366_v48 }
 0x2b3   :  { %2619 = vrsqrt.f32 %v1044_v55 }
 0x2c0   :  { %v2620_v56 = vpop.eup %2619 }
 0x2c1   :  { %v1046_v58 = vmul.f32 %v2620_v56, %v96_v42 }
 0x2c3   :  { %v1067_v45 = vrot.slane %v1046_v58, %v3829_v13 }
 0x2c5   :  { %v1084_v31 = vmul.f32 %v1067_v45, %v1062_v27  ;;  %v1069_v47 = vmul.f32 %v1067_v45, %v1047_v36  ;;  %v1070_v63 = vmul.f32 %v1067_v45, %v1048_v38  ;;  %v1071_v2 = vmul.f32 %v1067_v45, %v1049_v25 }
 0x2c6   :  { %v1072_v46 = vmul.f32 %v1067_v45, %v1050_v22  ;;  %v1073_v20 = vmul.f32 %v1067_v45, %v1051_v17  ;;  %v1074_v28 = vmul.f32 %v1067_v45, %v1052_v51  ;;  %v1075_v23 = vmul.f32 %v1067_v45, %v1053_v37 }
 0x2c7   :  { %v1106_v55 = vadd.f32 %v2159_v41, %v1084_v31  ;;  %v1091_v0 = vadd.f32 %v2159_v41, %v1069_v47  ;;  %v1092_v44 = vadd.f32 %v2159_v41, %v1070_v63  ;;  %v1093_v42 = vadd.f32 %v2159_v41, %v1071_v2 }
 0x2c8   :  { %v1094_v56 = vadd.f32 %v2159_v41, %v1072_v46  ;;  %v1095_v59 = vadd.f32 %v2159_v41, %v1073_v20  ;;  %v1096_v58 = vadd.f32 %v2159_v41, %v1074_v28  ;;  %v1097_v13 = vadd.f32 %v2159_v41, %v1075_v23 }
 0x2c9   :  { %1122 = vst.msk [vmem:[#allocation2 + $0x78] sm:$0xff] %vm740_vm1, %v1106_v55  ;;  %1107 = vst.msk [vmem:[#allocation2] sm:$0xff] %vm740_vm1, %v1091_v0  ;;  %v1076_v52 = vmul.f32 %v1067_v45, %v1054_v49  ;;  %v1077_v19 = vmul.f32 %v1067_v45, %v1055_v57  ;;  %v1078_v48 = vmul.f32 %v1067_v45, %v1056_v35 }
 0x2ca   :  { %1108 = vst.msk [vmem:[#allocation2 + $0x8] sm:$0xff] %vm740_vm1, %v1092_v44  ;;  %1109 = vst.msk [vmem:[#allocation2 + $0x10] sm:$0xff] %vm740_vm1, %v1093_v42  ;;  %v1079_v27 = vmul.f32 %v1067_v45, %v1057_v32  ;;  %v1080_v36 = vmul.f32 %v1067_v45, %v1058_v43  ;;  %v1081_v38 = vmul.f32 %v1067_v45, %v1059_v33  ;;  %v1140_v33 = vld [vmem:[%s3816_s7 + $0x8] sm:$0xff] }
 0x2cb   :  { %1110 = vst.msk [vmem:[#allocation2 + $0x18] sm:$0xff] %vm740_vm1, %v1094_v56  ;;  %1111 = vst.msk [vmem:[#allocation2 + $0x20] sm:$0xff] %vm740_vm1, %v1095_v59  ;;  %v1082_v25 = vmul.f32 %v1067_v45, %v1060_v61  ;;  %v1083_v22 = vmul.f32 %v1067_v45, %v1061_v16  ;;  %v1098_v17 = vadd.f32 %v2159_v41, %v1076_v52  ;;  %v1139_v16 = vld [vmem:[%s3816_s7] sm:$0xff] }
 0x2cc   :  { %1112 = vst.msk [vmem:[#allocation2 + $0x28] sm:$0xff] %vm740_vm1, %v1096_v58  ;;  %1113 = vst.msk [vmem:[#allocation2 + $0x30] sm:$0xff] %vm740_vm1, %v1097_v13  ;;  %v1099_v51 = vadd.f32 %v2159_v41, %v1077_v19  ;;  %v1100_v37 = vadd.f32 %v2159_v41, %v1078_v48  ;;  %v1101_v31 = vadd.f32 %v2159_v41, %v1079_v27  ;;  %v2579_v56 = vld [vmem:[%s3810_s1] sm:$0xff]  }
 0x2cd   :  { %v1102_v49 = vadd.f32 %v2159_v41, %v1080_v36  ;;  %v1103_v57 = vadd.f32 %v2159_v41, %v1081_v38  ;;  %v1104_v35 = vadd.f32 %v2159_v41, %v1082_v25  ;;  %v1105_v32 = vadd.f32 %v2159_v41, %v1083_v22  ;;  %1114 = vst.msk [vmem:[#allocation2 + $0x38] sm:$0xff] %vm740_vm1, %v1098_v17  ;;  %v1141_v41 = vld [vmem:[%s3816_s7 + $0x10] sm:$0xff] }
 0x2ce   :  { %1115 = vst.msk [vmem:[#allocation2 + $0x40] sm:$0xff] %vm740_vm1, %v1099_v51  ;;  %1116 = vst.msk [vmem:[#allocation2 + $0x48] sm:$0xff] %vm740_vm1, %v1100_v37  ;;  %2466 = vmatprep.mubr.bf16.mxu0 %v2579_v56 }
 0x2cf   :  { %1117 = vst.msk [vmem:[#allocation2 + $0x50] sm:$0xff] %vm740_vm1, %v1101_v31  ;;  %1118 = vst.msk [vmem:[#allocation2 + $0x58] sm:$0xff] %vm740_vm1, %v1102_v49 }
 0x2d0   :  { %1119 = vst.msk [vmem:[#allocation2 + $0x60] sm:$0xff] %vm740_vm1, %v1103_v57  ;;  %1120 = vst.msk [vmem:[#allocation2 + $0x68] sm:$0xff] %vm740_vm1, %v1104_v35  ;;  %v1123_v13 = vld [vmem:[#allocation2] sm:$0xff]  ;;  %v1138_v42 = vld [vmem:[#allocation2 + $0x78] sm:$0xff] }
 0x2d1   :  { %1121 = vst.msk [vmem:[#allocation2 + $0x70] sm:$0xff] %vm740_vm1, %v1105_v32  ;;  %v1124_v45 = vld [vmem:[#allocation2 + $0x8] sm:$0xff]  ;;  %2426 = vmatprep.mubr.msk.f32.mxu1 %vm740_vm1, %v1123_v13  ;;  %v1125_v43 = vld [vmem:[#allocation2 + $0x10] sm:$0xff] }
 0x2d2   :  { %2427 = vmatmul.mubr.msk.f32.vlgmr.msra.gmra.mxu1 %vm740_vm1, %v1124_v45  ;;  %v1126_v61 = vld [vmem:[#allocation2 + $0x18] sm:$0xff]  ;;  %v1127_v47 = vld [vmem:[#allocation2 + $0x20] sm:$0xff] }
 0x2d3   :  { %2429 = vmatprep.mubr.msk.f32.mxu1 %vm740_vm1, %v1125_v43  ;;  %2483 = vmatpush3.msra.mxu1 %v3214_v53  ;;  %v1128_v53 = vld [vmem:[#allocation2 + $0x28] sm:$0xff]  ;;  %v1129_v63 = vld [vmem:[#allocation2 + $0x30] sm:$0xff] }
 0x2d4   :  { %2484 = vmatprep.subr.mxu1 %v1141_v41  ;;  %v1130_v2 = vld [vmem:[#allocation2 + $0x38] sm:$0xff] }
 0x2d5   :  { %2485 = vmatpush3.msra.mxu1 %v1141_v41  ;;  %v1131_v46 = vld [vmem:[#allocation2 + $0x40] sm:$0xff]  ;;  %v1132_v20 = vld [vmem:[#allocation2 + $0x48] sm:$0xff] }
 0x2d6   :  { %2430 = vmatmul.mubr.msk.f32.gmra.mxu1 %vm740_vm1, %v1126_v61  ;;  %2486 = vmatprep.subr.mxu1 %v1140_v33  ;;  %v1133_v28 = vld [vmem:[#allocation2 + $0x50] sm:$0xff]  ;;  %v1134_v23 = vld [vmem:[#allocation2 + $0x58] sm:$0xff] }
 0x2d7   :  { %2432 = vmatprep.mubr.msk.f32.mxu1 %vm740_vm1, %v1127_v47  ;;  %2487 = vmatpush3.msra.mxu1 %v1140_v33  ;;  %v1135_v55 = vld [vmem:[#allocation2 + $0x60] sm:$0xff]  ;;  %v1136_v0 = vld [vmem:[#allocation2 + $0x68] sm:$0xff] }
 0x2d8   :  { %2488 = vmatprep.subr.mxu1 %v1139_v16  ;;  %v1137_v44 = vld [vmem:[#allocation2 + $0x70] sm:$0xff] }
 0x2d9   :  { %2489 = vmatpush3.msra.mxu1 %v1139_v16  ;;  %v2580_v16 = vld [vmem:[%s3810_s1 + $0x8] sm:$0xff]  }
 0x2da   :  { %2433 = vmatmul.mubr.msk.f32.gmra.mxu1 %vm740_vm1, %v1128_v53 }
 0x2db   :  { %2435 = vmatprep.mubr.msk.f32.mxu1 %vm740_vm1, %v1129_v63 }
 0x2de   :  { %2436 = vmatmul.mubr.msk.f32.gmra.mxu1 %vm740_vm1, %v1130_v2 }
 0x2df   :  { %2438 = vmatprep.mubr.msk.f32.mxu1 %vm740_vm1, %v1131_v46 }
 0x2e2   :  { %2439 = vmatmul.mubr.msk.f32.gmra.mxu1 %vm740_vm1, %v1132_v20 }
 0x2e3   :  { %2441 = vmatprep.mubr.msk.f32.mxu1 %vm740_vm1, %v1133_v28 }
 0x2e6   :  { %2442 = vmatmul.mubr.msk.f32.gmra.mxu1 %vm740_vm1, %v1134_v23 }
 0x2e7   :  { %2444 = vmatprep.mubr.msk.f32.mxu1 %vm740_vm1, %v1135_v55 }
 0x2ea   :  { %2445 = vmatmul.mubr.msk.f32.gmra.mxu1 %vm740_vm1, %v1136_v0 }
 0x2eb   :  { %2447 = vmatprep.mubr.msk.f32.mxu1 %vm740_vm1, %v1137_v44 }
 0x2ee   :  { %2448 = vmatmul.mubr.msk.f32.gmra.mxu1 %vm740_vm1, %v1138_v42 }
 0x2ef   :  { %2490 = vmatprep.mubr.msk.f32.mxu1 %vm740_vm1, %v1123_v13 }
 0x2f2   :  { %2491 = vmatmul.mubr.msk.f32.vlgmr.msra.gmra.mxu1 %vm740_vm1, %v1124_v45 }
 0x2f3   :  { %2493 = vmatprep.mubr.msk.f32.mxu1 %vm740_vm1, %v1125_v43 }
 0x2f6   :  { %2494 = vmatmul.mubr.msk.f32.gmra.mxu1 %vm740_vm1, %v1126_v61 }
 0x2f7   :  { %2496 = vmatprep.mubr.msk.f32.mxu1 %vm740_vm1, %v1127_v47  ;;  %v2581_v47 = vld [vmem:[%s3810_s1 + $0x10] sm:$0xff]  }
 0x2fa   :  { %2497 = vmatmul.mubr.msk.f32.gmra.mxu1 %vm740_vm1, %v1128_v53  ;;  %v2582_v53 = vld [vmem:[%s3810_s1 + $0x18] sm:$0xff]  }
 0x2fb   :  { %2499 = vmatprep.mubr.msk.f32.mxu1 %vm740_vm1, %v1129_v63  ;;  %v2583_v63 = vld [vmem:[%s3810_s1 + $0x20] sm:$0xff]  }
 0x2fe   :  { %2500 = vmatmul.mubr.msk.f32.gmra.mxu1 %vm740_vm1, %v1130_v2  ;;  %v2584_v2 = vld [vmem:[%s3810_s1 + $0x28] sm:$0xff]  }
 0x2ff   :  { %2502 = vmatprep.mubr.msk.f32.mxu1 %vm740_vm1, %v1131_v46  ;;  %v2585_v46 = vld [vmem:[%s3810_s1 + $0x30] sm:$0xff]  }
 0x302   :  { %2503 = vmatmul.mubr.msk.f32.gmra.mxu1 %vm740_vm1, %v1132_v20  ;;  %v2586_v20 = vld [vmem:[%s3810_s1 + $0x38] sm:$0xff]  }
 0x303   :  { %2505 = vmatprep.mubr.msk.f32.mxu1 %vm740_vm1, %v1133_v28 }
 0x306   :  { %2506 = vmatmul.mubr.msk.f32.gmra.mxu1 %vm740_vm1, %v1134_v23 }
 0x307   :  { %2508 = vmatprep.mubr.msk.f32.mxu1 %vm740_vm1, %v1135_v55 }
 0x30a   :  { %2509 = vmatmul.mubr.msk.f32.gmra.mxu1 %vm740_vm1, %v1136_v0 }
 0x30b   :  { %2511 = vmatprep.mubr.msk.f32.mxu1 %vm740_vm1, %v1137_v44 }
 0x30e   :  { %2512 = vmatmul.mubr.msk.f32.gmra.mxu1 %vm740_vm1, %v1138_v42 }
 0x392   :  { %v2428_v59 = vpop.f32.mrf.mxu1 }
 0x394   :  { %v1267_v58 = vpop.f32.mrf.mxu1 }
 0x395   :  { %v1362_v61 = vpack.c.bf16 %v2428_v59, %v1267_v58 }
 0x396   :  { %v2431_v52 = vpop.f32.mrf.mxu1 }
 0x398   :  { %v1277_v19 = vpop.f32.mrf.mxu1 }
 0x399   :  { %v1363_v33 = vpack.c.bf16 %v2431_v52, %v1277_v19 }
 0x39a   :  { %v2434_v48 = vpop.f32.mrf.mxu1 }
 0x39c   :  { %v1287_v27 = vpop.f32.mrf.mxu1 }
 0x39d   :  { %v1364_v43 = vpack.c.bf16 %v2434_v48, %v1287_v27 }
 0x39e   :  { %v2437_v36 = vpop.f32.mrf.mxu1 }
 0x3a0   :  { %v1297_v38 = vpop.f32.mrf.mxu1 }
 0x3a1   :  { %v1365_v41 = vpack.c.bf16 %v2437_v36, %v1297_v38 }
 0x3a2   :  { %v2440_v25 = vpop.f32.mrf.mxu1 }
 0x3a4   :  { %v1307_v22 = vpop.f32.mrf.mxu1 }
 0x3a5   :  { %v1366_v45 = vpack.c.bf16 %v2440_v25, %v1307_v22 }
 0x3a6   :  { %v2443_v17 = vpop.f32.mrf.mxu1 }
 0x3a8   :  { %v1317_v51 = vpop.f32.mrf.mxu1 }
 0x3a9   :  { %v1367_v13 = vpack.c.bf16 %v2443_v17, %v1317_v51  ;;  %v3502_v17 = vld [vmem:[%s3818_s9 + $0x1] ss:$0 sm:$0xff] }
 0x3aa   :  { %v2446_v37 = vpop.f32.mrf.mxu1 }
 0x3ac   :  { %v1327_v31 = vpop.f32.mrf.mxu1 }
 0x3ad   :  { %v1368_v32 = vpack.c.bf16 %v2446_v37, %v1327_v31 }
 0x3ae   :  { %v2449_v49 = vpop.f32.mrf.mxu1 }
 0x3b0   :  { %v1337_v57 = vpop.f32.mrf.mxu1 }
 0x3b1   :  { %v1369_v35 = vpack.c.bf16 %v2449_v49, %v1337_v57 }
 0x3b2   :  { %v2492_v28 = vpop.f32.mrf.mxu1 }
 0x3b3   :  { %2450 = vmatprep.subr.bf16.mxu0 %v1369_v35 }
 0x3b4   :  { %2451 = vmatpush3.bf16.msra.mxu0 %v1369_v35  ;;  %v1597_v23 = vpop.f32.mrf.mxu1 }
 0x3b5   :  { %2452 = vmatprep.subr.bf16.mxu0 %v1368_v32 }
 0x3b6   :  { %v2495_v55 = vpop.f32.mrf.mxu1 }
 0x3b8   :  { %2453 = vmatpush3.bf16.msra.mxu0 %v1368_v32  ;;  %v1607_v0 = vpop.f32.mrf.mxu1 }
 0x3b9   :  { %2454 = vmatprep.subr.bf16.mxu0 %v1367_v13 }
 0x3ba   :  { %v2498_v44 = vpop.f32.mrf.mxu1 }
 0x3bc   :  { %2455 = vmatpush3.bf16.msra.mxu0 %v1367_v13  ;;  %v1617_v42 = vpop.f32.mrf.mxu1 }
 0x3bd   :  { %2456 = vmatprep.subr.bf16.mxu0 %v1366_v45 }
 0x3be   :  { %v2501_v56 = vpop.f32.mrf.mxu1 }
 0x3c0   :  { %2457 = vmatpush3.bf16.msra.mxu0 %v1366_v45  ;;  %v1627_v59 = vpop.f32.mrf.mxu1 }
 0x3c1   :  { %2458 = vmatprep.subr.bf16.mxu0 %v1365_v41 }
 0x3c2   :  { %v3494_v19 = vpop.f32.mrf.mxu1 }
 0x3c4   :  { %2459 = vmatpush3.bf16.msra.mxu0 %v1365_v41  ;;  %v1637_v51 = vpop.f32.mrf.mxu1 }
 0x3c5   :  { %2460 = vmatprep.subr.bf16.mxu0 %v1364_v43 }
 0x3c6   :  { %v2507_v13 = vpop.f32.mrf.mxu1 }
 0x3c8   :  { %2461 = vmatpush3.bf16.msra.mxu0 %v1364_v43 }
 0x3c9   :  { %2462 = vmatprep.subr.bf16.mxu0 %v1363_v33 }
 0x3cc   :  { %2463 = vmatpush3.bf16.msra.mxu0 %v1363_v33 }
 0x3cd   :  { %2464 = vmatprep.subr.bf16.mxu0 %v1362_v61 }
 0x3d0   :  { %2465 = vmatpush3.bf16.msra.mxu0 %v1362_v61 }
 0x3d3   :  { %2467 = vmatmul.mubr.bf16.vlgmr.msra.gmra.mxu0 %v2580_v16 }
 0x3d4   :  { %2470 = vmatprep.mubr.bf16.mxu0 %v2581_v47 }
 0x3db   :  { %2471 = vmatmul.mubr.bf16.gmra.mxu0 %v2582_v53 }
 0x3dc   :  { %2474 = vmatprep.mubr.bf16.mxu0 %v2583_v63 }
 0x3e3   :  { %2475 = vmatmul.mubr.bf16.gmra.mxu0 %v2584_v2  ;;  %v1647_v2 = vpop.f32.mrf.mxu1 }
 0x3e4   :  { %2478 = vmatprep.mubr.bf16.mxu0 %v2585_v46 }
 0x3eb   :  { %2479 = vmatmul.mubr.bf16.gmra.mxu0 %v2586_v20 }
 0x493   :  { %v2468_v58 = vpop.f32.mrf.mxu0 }
 0x494   :  { %v1517_v27 = vmul.f32 %v2468_v58, %v3007_v3 }
 0x495   :  { %v1452_v52 = vpop.f32.mrf.mxu0 }
 0x496   :  { %v1515_v48 = vmul.f32 %v1452_v52, %v3009_v4  ;;  %v1608_v4 = vadd.f32 %v1607_v0, %v1517_v27  ;;  %v2510_v52 = vpop.f32.mrf.mxu1 }
 0x497   :  { %v2469_v36 = vpop.f32.mrf.mxu0 }
 0x498   :  { %v1598_v38 = vadd.f32 %v1597_v23, %v1515_v48  ;;  %v1518_v25 = vmul.f32 %v2469_v36, %v3011_v5  ;;  %v3522_v16 = vadd.f32 %v3502_v17, %v1608_v4 }
 0x499   :  { %v1455_v22 = vpop.f32.mrf.mxu0 }
 0x49a   :  { %v1613_v37 = vadd.f32 %v2495_v55, %v1518_v25  ;;  %v1516_v31 = vmul.f32 %v1455_v22, %v3013_v6  ;;  %v3506_v49 = vadd.f32 %v3502_v17, %v1598_v38  ;;  %v1700_v0 = vmul.f32 %v3522_v16, %v3522_v16 }
 0x49b   :  { %v2472_v57 = vpop.f32.mrf.mxu0 }
 0x49c   :  { %v1603_v3 = vadd.f32 %v2492_v28, %v1516_v31  ;;  %v1698_v35 = vmul.f32 %v3506_v49, %v3506_v49  ;;  %v3511_v5 = vadd.f32 %v3502_v17, %v1613_v37  ;;  %v1521_v43 = vmul.f32 %v2472_v57, %v3030_v39  ;;  %v1657_v31 = vpop.f32.mrf.mxu1 }
 0x49d   :  { %v1468_v32 = vpop.f32.mrf.mxu0  ;;  %v1720_v27 = vsel %vm740_vm1, %v1700_v0, 0.0 }
 0x49e   :  { %v1519_v45 = vmul.f32 %v1468_v32, %v3017_v14  ;;  %v1714_v41 = vsel %vm740_vm1, %v1698_v35, 0.0  ;;  %v1701_v6 = vmul.f32 %v3511_v5, %v3511_v5  ;;  %v3519_v61 = vadd.f32 %v3502_v17, %v1603_v3 }
 0x49f   :  { %1715 = vadd.xlane.f32.xlu1 %v1714_v41  ;;  %v2473_v33 = vpop.f32.mrf.mxu0  ;;  %v1628_v28 = vadd.f32 %v1627_v59, %v1521_v43  ;;  %v2513_v41 = vpop.f32.mrf.mxu1 }
 0x4a0   :  { %v1618_v47 = vadd.f32 %v1617_v42, %v1519_v45  ;;  %v1522_v53 = vmul.f32 %v2473_v33, %v3027_v34  ;;  %v1699_v14 = vmul.f32 %v3519_v61, %v3519_v61  ;;  %v1723_v39 = vsel %vm740_vm1, %v1701_v6, 0.0 }
 0x4a1   :  { %v1471_v63 = vpop.f32.mrf.mxu0 }
 0x4a2   :  { %v1633_v46 = vadd.f32 %v2501_v56, %v1522_v53  ;;  %v1520_v20 = vmul.f32 %v1471_v63, %v3015_v11  ;;  %v1717_v23 = vsel %vm740_vm1, %v1699_v14, 0.0  ;;  %v3533_v34 = vadd.f32 %v3502_v17, %v1618_v47 }
 0x4a3   :  { %1724 = vadd.xlane.f32.xlu1 %v1723_v39  ;;  %v2476_v55 = vpop.f32.mrf.mxu0  ;;  %1718 = vadd.xlane.f32.xlu0 %v1717_v23 }
 0x4a4   :  { %v1623_v42 = vadd.f32 %v2498_v44, %v1520_v20  ;;  %v3540_v59 = vadd.f32 %v3502_v17, %v1633_v46  ;;  %v1525_v48 = vmul.f32 %v2476_v55, %v3077_v7  ;;  %v1702_v38 = vmul.f32 %v3533_v34, %v3533_v34 }
 0x4a5   :  { %v1484_v58 = vpop.f32.mrf.mxu0  ;;  %v3547_v44 = vadd.f32 %v3502_v17, %v1628_v28  ;;  %v1667_v28 = vpop.f32.mrf.mxu1 }
 0x4a6   :  { %v1523_v56 = vmul.f32 %v1484_v58, %v3054_v60  ;;  %v3537_v11 = vadd.f32 %v3502_v17, %v1623_v42  ;;  %v1705_v3 = vmul.f32 %v3540_v59, %v3540_v59  ;;  %v1648_v35 = vadd.f32 %v1647_v2, %v1525_v48 }
 0x4a7   :  { %v2477_v36 = vpop.f32.mrf.mxu0  ;;  %1721 = vadd.xlane.f32.xlu0 %v1720_v27  ;;  %v1726_v32 = vsel %vm740_vm1, %v1702_v38, 0.0 }
 0x4a8   :  { %v1638_v25 = vadd.f32 %v1637_v51, %v1523_v56  ;;  %v1526_v60 = vmul.f32 %v2477_v36, %v3067_v24  ;;  %v1703_v22 = vmul.f32 %v3537_v11, %v3537_v11  ;;  %v1704_v24 = vmul.f32 %v3547_v44, %v3547_v44 }
 0x4a9   :  { %v1487_v37 = vpop.f32.mrf.mxu0  ;;  %v1735_v43 = vsel %vm740_vm1, %v1705_v3, 0.0  ;;  %v3576_v2 = vadd.f32 %v3502_v17, %v1648_v35 }
 0x4aa   :  { %v1653_v4 = vadd.f32 %v2507_v13, %v1526_v60  ;;  %v1524_v7 = vmul.f32 %v1487_v37, %v3046_v54  ;;  %v1729_v57 = vsel %vm740_vm1, %v1703_v22, 0.0  ;;  %v3560_v45 = vadd.f32 %v3502_v17, %v1638_v25 }
 0x4ab   :  { %1730 = vadd.xlane.f32.xlu1 %v1729_v57  ;;  %v2480_v51 = vpop.f32.mrf.mxu0  ;;  %1727 = vadd.xlane.f32.xlu0 %v1726_v32  ;;  %v1732_v63 = vsel %vm740_vm1, %v1704_v24, 0.0  ;;  %v2678_v57 = vmov 0.0  }
 0x4ac   :  { %v1643_v13 = vadd.f32 %v3494_v19, %v1524_v7  ;;  %v3569_v47 = vadd.f32 %v3502_v17, %v1653_v4  ;;  %v1529_v53 = vmul.f32 %v2480_v51, %v3129_v30  ;;  %v1706_v19 = vmul.f32 %v3560_v45, %v3560_v45  ;;  %2514 = vmatprep.subr.mxu0 %v2678_v57 }
 0x4ad   :  { %v1500_v54 = vpop.f32.mrf.mxu0  ;;  %2546 = vmatprep.mubr.msk.f32.mxu0 %vm2679_vm2, %v2678_v57 }
 0x4ae   :  { %v1527_v6 = vmul.f32 %v1500_v54, %v3102_v50  ;;  %v3566_v33 = vadd.f32 %v3502_v17, %v1643_v13  ;;  %v1709_v0 = vmul.f32 %v3569_v47, %v3569_v47  ;;  %v1668_v42 = vadd.f32 %v1667_v28, %v1529_v53 }
 0x4af   :  { %1736 = vadd.xlane.f32.xlu1 %v1735_v43  ;;  %v2481_v14 = vpop.f32.mrf.mxu0  ;;  %1733 = vadd.xlane.f32.xlu0 %v1732_v63  ;;  %v1738_v58 = vsel %vm740_vm1, %v1706_v19, 0.0 }
 0x4b0   :  { %v1658_v50 = vadd.f32 %v1657_v31, %v1527_v6  ;;  %v1530_v46 = vmul.f32 %v2481_v14, %v3118_v18  ;;  %v1707_v20 = vmul.f32 %v3566_v33, %v3566_v33  ;;  %v1708_v18 = vmul.f32 %v3576_v2, %v3576_v2 }
 0x4b1   :  { %v1503_v39 = vpop.f32.mrf.mxu0  ;;  %v1747_v27 = vsel %vm740_vm1, %v1709_v0, 0.0  ;;  %v3602_v60 = vadd.f32 %v3502_v17, %v1668_v42 }
 0x4b2   :  { %v1673_v30 = vadd.f32 %v2513_v41, %v1530_v46  ;;  %v1528_v23 = vmul.f32 %v1503_v39, %v3093_v40  ;;  %v1741_v55 = vsel %vm740_vm1, %v1707_v20, 0.0  ;;  %v3589_v56 = vadd.f32 %v3502_v17, %v1658_v50 }
 0x4b3   :  { %1742 = vadd.xlane.f32.xlu1 %v1741_v55  ;;  %1739 = vadd.xlane.f32.xlu0 %v1738_v58  ;;  %v1744_v38 = vsel %vm740_vm1, %v1708_v18, 0.0  ;;  %v1712_v4 = vmul.f32 %v3602_v60, %v3602_v60 }
 0x4b4   :  { %v1663_v48 = vadd.f32 %v2510_v52, %v1528_v23  ;;  %v3596_v36 = vadd.f32 %v3502_v17, %v1673_v30  ;;  %v1710_v25 = vmul.f32 %v3589_v56, %v3589_v56 }
 0x4b6   :  { %v3593_v40 = vadd.f32 %v3502_v17, %v1663_v48  ;;  %v1713_v37 = vmul.f32 %v3596_v36, %v3596_v36  ;;  %v1750_v31 = vsel %vm740_vm1, %v1710_v25, 0.0  ;;  %v1756_v17 = vsel %vm740_vm1, %v1712_v4, 0.0 }
 0x4b7   :  { %1748 = vadd.xlane.f32.xlu1 %v1747_v27  ;;  %1745 = vadd.xlane.f32.xlu0 %v1744_v38 }
 0x4b8   :  { %v1711_v52 = vmul.f32 %v3593_v40, %v3593_v40  ;;  %v1759_v7 = vsel %vm740_vm1, %v1713_v37, 0.0 }
 0x4ba   :  { %v1753_v22 = vsel %vm740_vm1, %v1711_v52, 0.0 }
 0x4bb   :  { %1754 = vadd.xlane.f32.xlu1 %v1753_v22  ;;  %1751 = vadd.xlane.f32.xlu0 %v1750_v31 }
 0x4bf   :  { %1760 = vadd.xlane.f32.xlu1 %v1759_v7  ;;  %1757 = vadd.xlane.f32.xlu0 %v1756_v17 }
 0x528   :  { %v1716_v3 = vpop.xlane.xlu1 %1715 }
 0x529   :  { %v1762_v35 = vmax.f32 %v1716_v3, 1e-24 }
 0x52b   :  { %2621 = vrsqrt.f32 %v1762_v35 }
 0x52c   :  { %v1725_v32 = vpop.xlane.xlu1 %1724  ;;  %v1719_v24 = vpop.xlane.xlu0 %1718 }
 0x52d   :  { %v1765_v51 = vmax.f32 %v1725_v32, 1e-24  ;;  %v1763_v13 = vmax.f32 %v1719_v24, 1e-24 }
 0x52f   :  { %2623 = vrsqrt.f32 %v1765_v51 }
 0x530   :  { %2625 = vrsqrt.f32 %v1763_v13  ;;  %v1722_v54 = vpop.xlane.xlu0 %1721 }
 0x531   :  { %v1764_v41 = vmax.f32 %v1722_v54, 1e-24 }
 0x533   :  { %2627 = vrsqrt.f32 %v1764_v41 }
 0x534   :  { %v1731_v6 = vpop.xlane.xlu1 %1730  ;;  %v1728_v43 = vpop.xlane.xlu0 %1727 }
 0x535   :  { %v1767_v53 = vmax.f32 %v1731_v6, 1e-24  ;;  %v1766_v63 = vmax.f32 %v1728_v43, 1e-24  ;;  %v3837_v43 = vld [vmem:[#allocation6_spill] sm:$0xff] }
 0x537   :  { %2629 = vrsqrt.f32 %v1767_v53 }
 0x538   :  { %v2622_v14 = vpop.eup %2621  ;;  %2631 = vrsqrt.f32 %v1766_v63  ;;  %v1737_v19 = vpop.xlane.xlu1 %1736 }
 0x539   :  { %v1794_v50 = vmul.f32 %v2622_v14, %v3506_v49  ;;  %v1734_v46 = vpop.xlane.xlu0 %1733  ;;  %v1769_v20 = vmax.f32 %v1737_v19, 1e-24 }
 0x53a   :  { %v1768_v39 = vmax.f32 %v1734_v46, 1e-24 }
 0x53b   :  { %v1810_v28 = vmax.f32 %v1794_v50, 0.0  ;;  %2633 = vrsqrt.f32 %v1769_v20 }
 0x53c   :  { %v2624_v30 = vpop.eup %2623  ;;  %2635 = vrsqrt.f32 %v1768_v39  ;;  %v1743_v23 = vpop.xlane.xlu1 %1742 }
 0x53d   :  { %v2626_v55 = vpop.eup %2625  ;;  %v3618_v0 = vmul.f32 %v1810_v28, %v3177_v62  ;;  %v1797_v42 = vmul.f32 %v2624_v30, %v3511_v5  ;;  %v1740_v58 = vpop.xlane.xlu0 %1739  ;;  %v1771_v18 = vmax.f32 %v1743_v23, 1e-24 }
 0x53e   :  { %v1795_v49 = vmul.f32 %v2626_v55, %v3519_v61  ;;  %v1770_v48 = vmax.f32 %v1740_v58, 1e-24 }
 0x53f   :  { %v1813_v27 = vmax.f32 %v1797_v42, 0.0  ;;  %2637 = vrsqrt.f32 %v1771_v18  ;;  %v1880_v22 = vmul.f32 %v3618_v0, %v3618_v0  ;;  %v1842_v7 = vsel %vm740_vm1, %v3618_v0, 0.0 }
 0x540   :  { %v1811_v38 = vmax.f32 %v1795_v49, 0.0  ;;  %2639 = vrsqrt.f32 %v1770_v48  ;;  %v1749_v25 = vpop.xlane.xlu1 %1748  ;;  %v2628_v52 = vpop.eup %2627  ;;  %v3838_v48 = vld [vmem:[#allocation7_spill] sm:$0xff] }
 0x541   :  { %v3625_v37 = vmul.f32 %v1813_v27, %v3181_v1  ;;  %v1746_v62 = vpop.xlane.xlu0 %1745  ;;  %v1773_v31 = vmax.f32 %v1749_v25, 1e-24  ;;  %v1796_v61 = vmul.f32 %v2628_v52, %v3522_v16  ;;  %v1896_v16 = vsel %vm740_vm1, %v1880_v22, 0.0 }
 0x542   :  { %v3628_v5 = vmul.f32 %v1811_v38, %v3207_v15  ;;  %v1772_v4 = vmax.f32 %v1746_v62, 1e-24 }
 0x543   :  { %v1883_v17 = vmul.f32 %v3625_v37, %v3625_v37  ;;  %2641 = vrsqrt.f32 %v1773_v31  ;;  %v1812_v32 = vmax.f32 %v1796_v61, 0.0  ;;  %v1847_v24 = vsel %vm740_vm1, %v3625_v37, 0.0 }
 0x544   :  { %v2630_v3 = vpop.eup %2629  ;;  %v1843_v1 = vsel %vm740_vm1, %v3628_v5, 0.0  ;;  %v1881_v35 = vmul.f32 %v3628_v5, %v3628_v5  ;;  %2643 = vrsqrt.f32 %v1772_v4  ;;  %v1755_v15 = vpop.xlane.xlu1 %1754 }
 0x545   :  { %v2632_v51 = vpop.eup %2631  ;;  %v1799_v13 = vmul.f32 %v2630_v3, %v3537_v11  ;;  %v1752_v54 = vpop.xlane.xlu0 %1751  ;;  %v1775_v41 = vmax.f32 %v1755_v15, 1e-24  ;;  %v3645_v53 = vmul.f32 %v1812_v32, %v3837_v43  ;;  %v1901_v19 = vsel %vm740_vm1, %v1883_v17, 0.0 }
 0x546   :  { %v1897_v6 = vsel %vm740_vm1, %v1881_v35, 0.0  ;;  %v1798_v63 = vmul.f32 %v2632_v51, %v3533_v34  ;;  %v1774_v14 = vmax.f32 %v1752_v54, 1e-24  ;;  %v1844_v50 = vadd.f32 %v1843_v1, %v1842_v7 }
 0x547   :  { %v1815_v46 = vmax.f32 %v1799_v13, 0.0  ;;  %2645 = vrsqrt.f32 %v1775_v41  ;;  %v1845_v39 = vsel %vm740_vm1, %v3645_v53, 0.0  ;;  %v1882_v11 = vmul.f32 %v3645_v53, %v3645_v53 }
 0x548   :  { %v2634_v20 = vpop.eup %2633  ;;  %v1814_v28 = vmax.f32 %v1798_v63, 0.0  ;;  %2647 = vrsqrt.f32 %v1774_v14  ;;  %v1761_v30 = vpop.xlane.xlu1 %1760  ;;  %v1898_v55 = vadd.f32 %v1897_v6, %v1896_v16  ;;  %v1846_v42 = vadd.f32 %v1845_v39, %v1844_v50 }
 0x549   :  { %v2636_v23 = vpop.eup %2635  ;;  %v3654_v34 = vmul.f32 %v1815_v46, %v3185_v21  ;;  %v1801_v58 = vmul.f32 %v2634_v20, %v3540_v59  ;;  %v1758_v18 = vpop.xlane.xlu0 %1757  ;;  %v1899_v49 = vsel %vm740_vm1, %v1882_v11, 0.0  ;;  %v1777_v25 = vmax.f32 %v1761_v30, 1e-24 }
 0x54a   :  { %v3659_v27 = vmul.f32 %v1814_v28, %v3838_v48  ;;  %v1800_v38 = vmul.f32 %v2636_v23, %v3547_v44  ;;  %v1900_v52 = vadd.f32 %v1899_v49, %v1898_v55  ;;  %v1848_v22 = vadd.f32 %v1847_v24, %v1846_v42 }
 0x54b   :  { %v1885_v62 = vmul.f32 %v3654_v34, %v3654_v34  ;;  %v1776_v31 = vmax.f32 %v1758_v18, 1e-24  ;;  %v1817_v7 = vmax.f32 %v1801_v58, 0.0  ;;  %v1851_v44 = vsel %vm740_vm1, %v3654_v34, 0.0 }
 0x54c   :  { %v2638_v61 = vpop.eup %2637  ;;  %v1849_v21 = vsel %vm740_vm1, %v3659_v27, 0.0  ;;  %v1884_v59 = vmul.f32 %v3659_v27, %v3659_v27  ;;  %v1816_v4 = vmax.f32 %v1800_v38, 0.0  ;;  %v1902_v3 = vadd.f32 %v1901_v19, %v1900_v52  ;;  %v3839_v52 = vld [vmem:[#allocation10_spill] sm:$0xff] }
 0x54d   :  { %v2640_v17 = vpop.eup %2639  ;;  %v1850_v1 = vadd.f32 %v1849_v21, %v1848_v22  ;;  %v1803_v35 = vmul.f32 %v2638_v61, %v3566_v33  ;;  %v3676_v51 = vmul.f32 %v1817_v7, %v3198_v29  ;;  %2649 = vrsqrt.f32 %v1776_v31 }
 0x54e   :  { %v1903_v32 = vsel %vm740_vm1, %v1884_v59, 0.0  ;;  %v3673_v15 = vmul.f32 %v1816_v4, %v3187_v26  ;;  %v1802_v16 = vmul.f32 %v2640_v17, %v3560_v45  ;;  %v1905_v6 = vsel %vm740_vm1, %v1885_v62, 0.0 }
 0x54f   :  { %v1904_v24 = vadd.f32 %v1903_v32, %v1902_v3  ;;  %v1852_v13 = vadd.f32 %v1851_v44, %v1850_v1  ;;  %v1819_v54 = vmax.f32 %v1803_v35, 0.0  ;;  %v1887_v26 = vmul.f32 %v3676_v51, %v3676_v51 }
 0x550   :  { %v2642_v41 = vpop.eup %2641  ;;  %v1853_v33 = vsel %vm740_vm1, %v3673_v15, 0.0  ;;  %v1886_v43 = vmul.f32 %v3673_v15, %v3673_v15  ;;  %v1818_v45 = vmax.f32 %v1802_v16, 0.0  ;;  %v1855_v46 = vsel %vm740_vm1, %v3676_v51, 0.0  ;;  %v3841_v16 = vld [vmem:[#allocation8_spill] sm:$0xff] }
 0x551   :  { %v2644_v29 = vpop.eup %2643  ;;  %v1906_v63 = vadd.f32 %v1905_v6, %v1904_v24  ;;  %v1854_v14 = vadd.f32 %v1853_v33, %v1852_v13  ;;  %v3687_v19 = vmul.f32 %v1819_v54, %v3205_v10  ;;  %v1805_v39 = vmul.f32 %v2642_v41, %v3569_v47 }
 0x552   :  { %v1907_v50 = vsel %vm740_vm1, %v1886_v43, 0.0  ;;  %v1804_v20 = vmul.f32 %v2644_v29, %v3576_v2  ;;  %v1909_v30 = vsel %vm740_vm1, %v1887_v26, 0.0  ;;  %v3696_v23 = vmul.f32 %v1818_v45, %v3203_v8 }
 0x553   :  { %v1908_v11 = vadd.f32 %v1907_v50, %v1906_v63  ;;  %v1856_v28 = vadd.f32 %v1855_v46, %v1854_v14  ;;  %v1889_v10 = vmul.f32 %v3687_v19, %v3687_v19  ;;  %v1821_v58 = vmax.f32 %v1805_v39, 0.0 }
 0x554   :  { %v2646_v55 = vpop.eup %2645  ;;  %v1820_v42 = vmax.f32 %v1804_v20, 0.0  ;;  %2651 = vrsqrt.f32 %v1777_v25  ;;  %v1857_v2 = vsel %vm740_vm1, %v3696_v23, 0.0  ;;  %v1888_v47 = vmul.f32 %v3696_v23, %v3696_v23 }
 0x555   :  { %v2648_v18 = vpop.eup %2647  ;;  %v1910_v49 = vadd.f32 %v1909_v30, %v1908_v11  ;;  %v1807_v48 = vmul.f32 %v2646_v55, %v3593_v40  ;;  %v1858_v38 = vadd.f32 %v1857_v2, %v1856_v28  ;;  %v3709_v22 = vmul.f32 %v1821_v58, %v3839_v52  ;;  %v3842_v28 = vld [vmem:[#allocation11_spill] sm:$0xff] }
 0x556   :  { %v3706_v8 = vmul.f32 %v1820_v42, %v3209_v12  ;;  %v1911_v62 = vsel %vm740_vm1, %v1888_v47, 0.0  ;;  %v1859_v25 = vsel %vm740_vm1, %v3687_v19, 0.0  ;;  %v1806_v31 = vmul.f32 %v2648_v18, %v3589_v56  ;;  %v3840_v56 = vld [vmem:[#allocation9_spill] sm:$0xff]  ;;  %v3843_v47 = vld [vmem:[#allocation12_spill] sm:$0xff] }
 0x557   :  { %v1823_v61 = vmax.f32 %v1807_v48, 0.0  ;;  %v1912_v21 = vadd.f32 %v1911_v62, %v1910_v49  ;;  %v1860_v59 = vadd.f32 %v1859_v25, %v1858_v38  ;;  %v1913_v4 = vsel %vm740_vm1, %v1889_v10, 0.0 }
 0x558   :  { %v1861_v40 = vsel %vm740_vm1, %v3706_v8, 0.0  ;;  %v1890_v12 = vmul.f32 %v3706_v8, %v3706_v8  ;;  %v1891_v7 = vmul.f32 %v3709_v22, %v3709_v22  ;;  %v1822_v17 = vmax.f32 %v1806_v31, 0.0 }
 0x559   :  { %v1914_v3 = vadd.f32 %v1913_v4, %v1912_v21  ;;  %v1862_v1 = vadd.f32 %v1861_v40, %v1860_v59  ;;  %v3724_v35 = vmul.f32 %v1823_v61, %v3840_v56  ;;  %v1863_v32 = vsel %vm740_vm1, %v3709_v22, 0.0 }
 0x55a   :  { %v1915_v44 = vsel %vm740_vm1, %v1890_v12, 0.0  ;;  %v3729_v24 = vmul.f32 %v1822_v17, %v3841_v16  ;;  %v2650_v13 = vpop.eup %2649  ;;  %v1917_v6 = vsel %vm740_vm1, %v1891_v7, 0.0 }
 0x55b   :  { %v1916_v54 = vadd.f32 %v1915_v44, %v1914_v3  ;;  %v1864_v41 = vadd.f32 %v1863_v32, %v1862_v1  ;;  %v1808_v26 = vmul.f32 %v2650_v13, %v3602_v60  ;;  %v1893_v14 = vmul.f32 %v3724_v35, %v3724_v35 }
 0x55c   :  { %v1865_v33 = vsel %vm740_vm1, %v3729_v24, 0.0  ;;  %v1892_v43 = vmul.f32 %v3729_v24, %v3729_v24  ;;  %v1867_v20 = vsel %vm740_vm1, %v3724_v35, 0.0 }
 0x55d   :  { %v1918_v29 = vadd.f32 %v1917_v6, %v1916_v54  ;;  %v1866_v63 = vadd.f32 %v1865_v33, %v1864_v41  ;;  %v1824_v50 = vmax.f32 %v1808_v26, 0.0  ;;  %v1921_v55 = vsel %vm740_vm1, %v1893_v14, 0.0  ;;  %v2161_v6 = vld [vmem:[%s3819_s10 + $0x1] sm:$0x1] }
 0x55e   :  { %v1919_v45 = vsel %vm740_vm1, %v1892_v43, 0.0 }
 0x55f   :  { %v1920_v46 = vadd.f32 %v1919_v45, %v1918_v29  ;;  %v1868_v11 = vadd.f32 %v1867_v20, %v1866_v63  ;;  %v1840_v30 = vmul.f32 %v1824_v50, %v3842_v28 }
 0x561   :  { %v2652_v39 = vpop.eup %2651  ;;  %v1922_v10 = vadd.f32 %v1921_v55, %v1920_v46  ;;  %v1869_v42 = vsel %vm740_vm1, %v1840_v30, 0.0  ;;  %v1894_v58 = vmul.f32 %v1840_v30, %v1840_v30 }
 0x562   :  { %v1809_v60 = vmul.f32 %v2652_v39, %v3596_v36  ;;  %v1870_v49 = vadd.f32 %v1869_v42, %v1868_v11  ;;  %v3844_v11 = vsub.s32 0, %v3370_v9 }
 0x563   :  { %v1923_v2 = vsel %vm740_vm1, %v1894_v58, 0.0 }
 0x564   :  { %v1825_v18 = vmax.f32 %v1809_v60, 0.0  ;;  %v1924_v38 = vadd.f32 %v1923_v2, %v1922_v10 }
 0x566   :  { %v1841_v48 = vmul.f32 %v1825_v18, %v3843_v47 }
 0x568   :  { %v1871_v52 = vsel %vm740_vm1, %v1841_v48, 0.0  ;;  %v1895_v62 = vmul.f32 %v1841_v48, %v1841_v48 }
 0x569   :  { %v1872_v25 = vadd.f32 %v1871_v52, %v1870_v49 }
 0x56a   :  { %v1925_v31 = vsel %vm740_vm1, %v1895_v62, 0.0 }
 0x56b   :  { %v1873_v61 = vrot.slane %v1872_v25, 4  ;;  %v1926_v21 = vadd.f32 %v1925_v31, %v1924_v38 }
 0x56d   :  { %v1874_v36 = vadd.f32 %v1873_v61, %v1872_v25  ;;  %v1927_v59 = vrot.slane %v1926_v21, 4 }
 0x56f   :  { %v1875_v40 = vrot.slane %v1874_v36, 2  ;;  %v1928_v12 = vadd.f32 %v1927_v59, %v1926_v21 }
 0x571   :  { %v1876_v4 = vadd.f32 %v1875_v40, %v1874_v36  ;;  %v1929_v7 = vrot.slane %v1928_v12, 2 }
 0x573   :  { %v1877_v17 = vrot.slane %v1876_v4, 1  ;;  %v1930_v3 = vadd.f32 %v1929_v7, %v1928_v12 }
 0x575   :  { %v1878_v1 = vadd.f32 %v1877_v17, %v1876_v4  ;;  %v1931_v44 = vrot.slane %v1930_v3, 1 }
 0x577   :  { %v1879_v56 = vmul.f32 0.0078125, %v1878_v1  ;;  %v1932_v32 = vadd.f32 %v1931_v44, %v1930_v3 }
 0x579   :  { %v1933_v16 = vmul.f32 0.0078125, %v1932_v32  ;;  %v1934_v13 = vmul.f32 %v1879_v56, %v1879_v56  ;;  %v1954_v43 = vsub.f32 %v1841_v48, %v1879_v56  ;;  %v1953_v26 = vsub.f32 %v1840_v30, %v1879_v56 }
 0x57a   :  { %v1952_v63 = vsub.f32 %v3724_v35, %v1879_v56  ;;  %v1951_v14 = vsub.f32 %v3729_v24, %v1879_v56  ;;  %v1950_v45 = vsub.f32 %v3709_v22, %v1879_v56  ;;  %v1949_v50 = vsub.f32 %v3706_v8, %v1879_v56  ;;  %v2204_v22 = vld [vmem:[%s3820_s11 + $0x1] ss:$0 sm:$0xff] }
 0x57b   :  { %v1935_v54 = vsub.f32 %v1933_v16, %v1934_v13  ;;  %v1948_v46 = vsub.f32 %v3687_v19, %v1879_v56  ;;  %v1947_v20 = vsub.f32 %v3696_v23, %v1879_v56  ;;  %v1946_v39 = vsub.f32 %v3676_v51, %v1879_v56 }
 0x57c   :  { %v1945_v30 = vsub.f32 %v3673_v15, %v1879_v56  ;;  %v1944_v55 = vsub.f32 %v3654_v34, %v1879_v56  ;;  %v1943_v35 = vsub.f32 %v3659_v27, %v1879_v56  ;;  %v1942_v8 = vsub.f32 %v3625_v37, %v1879_v56 }
 0x57d   :  { %v1936_v41 = vadd.f32 1e-05, %v1935_v54  ;;  %v1941_v19 = vsub.f32 %v3645_v53, %v1879_v56  ;;  %v1940_v23 = vsub.f32 %v3628_v5, %v1879_v56  ;;  %v1939_v51 = vsub.f32 %v3618_v0, %v1879_v56 }
 0x57f   :  { %2653 = vrsqrt.f32 %v1936_v41 }
 0x58c   :  { %v2654_v33 = vpop.eup %2653 }
 0x58d   :  { %v1938_v29 = vmul.f32 %v2654_v33, %v2161_v6 }
 0x58f   :  { %v1959_v28 = vrot.slane %v1938_v29, %v3844_v11 }
 0x591   :  { %v1976_v9 = vmul.f32 %v1959_v28, %v1954_v43  ;;  %v1975_v24 = vmul.f32 %v1959_v28, %v1953_v26  ;;  %v1974_v60 = vmul.f32 %v1959_v28, %v1952_v63  ;;  %v1973_v15 = vmul.f32 %v1959_v28, %v1951_v14  ;;  %v2015_v14 = vld [vmem:[%s3813_s4] sm:$0x3] }
 0x592   :  { %v1972_v10 = vmul.f32 %v1959_v28, %v1950_v45  ;;  %v1971_v34 = vmul.f32 %v1959_v28, %v1949_v50  ;;  %v1970_v42 = vmul.f32 %v1959_v28, %v1948_v46  ;;  %v1969_v27 = vmul.f32 %v1959_v28, %v1947_v20 }
 0x593   :  { %v1998_v58 = vadd.f32 %v2204_v22, %v1976_v9  ;;  %v1997_v18 = vadd.f32 %v2204_v22, %v1975_v24  ;;  %v1996_v49 = vadd.f32 %v2204_v22, %v1974_v60  ;;  %v1995_v2 = vadd.f32 %v2204_v22, %v1973_v15 }
 0x594   :  { %v1994_v47 = vadd.f32 %v2204_v22, %v1972_v10  ;;  %v1993_v37 = vadd.f32 %v2204_v22, %v1971_v34  ;;  %v1992_v48 = vadd.f32 %v2204_v22, %v1970_v42  ;;  %v1991_v53 = vadd.f32 %v2204_v22, %v1969_v27 }
 0x595   :  { %2014 = vst.msk [vmem:[#allocation2 + $0x78] sm:$0xff] %vm740_vm1, %v1998_v58  ;;  %2013 = vst.msk [vmem:[#allocation2 + $0x70] sm:$0xff] %vm740_vm1, %v1997_v18  ;;  %v1968_v0 = vmul.f32 %v1959_v28, %v1946_v39  ;;  %v1967_v5 = vmul.f32 %v1959_v28, %v1945_v30  ;;  %v1966_v38 = vmul.f32 %v1959_v28, %v1944_v55 }
 0x596   :  { %2012 = vst.msk [vmem:[#allocation2 + $0x68] sm:$0xff] %vm740_vm1, %v1996_v49  ;;  %2011 = vst.msk [vmem:[#allocation2 + $0x60] sm:$0xff] %vm740_vm1, %v1995_v2  ;;  %v1965_v52 = vmul.f32 %v1959_v28, %v1943_v35  ;;  %v1964_v62 = vmul.f32 %v1959_v28, %v1942_v8  ;;  %v1963_v25 = vmul.f32 %v1959_v28, %v1941_v19 }
 0x597   :  { %2010 = vst.msk [vmem:[#allocation2 + $0x58] sm:$0xff] %vm740_vm1, %v1994_v47  ;;  %2009 = vst.msk [vmem:[#allocation2 + $0x50] sm:$0xff] %vm740_vm1, %v1993_v37  ;;  %v1962_v31 = vmul.f32 %v1959_v28, %v1940_v23  ;;  %v1961_v61 = vmul.f32 %v1959_v28, %v1939_v51  ;;  %v1990_v21 = vadd.f32 %v2204_v22, %v1968_v0 }
 0x598   :  { %2008 = vst.msk [vmem:[#allocation2 + $0x48] sm:$0xff] %vm740_vm1, %v1992_v48  ;;  %2007 = vst.msk [vmem:[#allocation2 + $0x40] sm:$0xff] %vm740_vm1, %v1991_v53  ;;  %v1989_v36 = vadd.f32 %v2204_v22, %v1967_v5  ;;  %v1988_v59 = vadd.f32 %v2204_v22, %v1966_v38  ;;  %v1987_v40 = vadd.f32 %v2204_v22, %v1965_v52 }
 0x599   :  { %v1986_v12 = vadd.f32 %v2204_v22, %v1964_v62  ;;  %v1985_v4 = vadd.f32 %v2204_v22, %v1963_v25  ;;  %v1984_v7 = vadd.f32 %v2204_v22, %v1962_v31  ;;  %v1983_v17 = vadd.f32 %v2204_v22, %v1961_v61  ;;  %2006 = vst.msk [vmem:[#allocation2 + $0x38] sm:$0xff] %vm740_vm1, %v1990_v21 }
 0x59a   :  { %2005 = vst.msk [vmem:[#allocation2 + $0x30] sm:$0xff] %vm740_vm1, %v1989_v36  ;;  %2004 = vst.msk [vmem:[#allocation2 + $0x28] sm:$0xff] %vm740_vm1, %v1988_v59 }
 0x59b   :  { %2003 = vst.msk [vmem:[#allocation2 + $0x20] sm:$0xff] %vm740_vm1, %v1987_v40  ;;  %2002 = vst.msk [vmem:[#allocation2 + $0x18] sm:$0xff] %vm740_vm1, %v1986_v12 }
 0x59c   :  { %2001 = vst.msk [vmem:[#allocation2 + $0x10] sm:$0xff] %vm740_vm1, %v1985_v4  ;;  %2000 = vst.msk [vmem:[#allocation2 + $0x8] sm:$0xff] %vm740_vm1, %v1984_v7  ;;  %v2031_v3 = vld [vmem:[#allocation2 + $0x78] sm:$0xff]  ;;  %v2030_v1 = vld [vmem:[#allocation2 + $0x70] sm:$0xff] }
 0x59d   :  { %1999 = vst.msk [vmem:[#allocation2] sm:$0xff] %vm740_vm1, %v1983_v17  ;;  %2515 = vmatpush3.msra.mxu0 %v2031_v3  ;;  %v2029_v44 = vld [vmem:[#allocation2 + $0x68] sm:$0xff]  ;;  %v2028_v56 = vld [vmem:[#allocation2 + $0x60] sm:$0xff] }
 0x59e   :  { %2516 = vmatprep.subr.mxu0 %v2678_v57  ;;  %v2027_v32 = vld [vmem:[#allocation2 + $0x58] sm:$0xff]  ;;  %v2026_v16 = vld [vmem:[#allocation2 + $0x50] sm:$0xff] }
 0x59f   :  { %2517 = vmatpush3.msra.mxu0 %v2030_v1  ;;  %v2025_v13 = vld [vmem:[#allocation2 + $0x48] sm:$0xff]  ;;  %v2024_v54 = vld [vmem:[#allocation2 + $0x40] sm:$0xff] }
 0x5a0   :  { %2518 = vmatprep.subr.mxu0 %v2678_v57  ;;  %v2023_v41 = vld [vmem:[#allocation2 + $0x38] sm:$0xff] }
 0x5a1   :  { %2519 = vmatpush3.msra.mxu0 %v2029_v44  ;;  %v2022_v6 = vld [vmem:[#allocation2 + $0x30] sm:$0xff]  ;;  %v2021_v33 = vld [vmem:[#allocation2 + $0x28] sm:$0xff] }
 0x5a2   :  { %2520 = vmatprep.subr.mxu0 %v2678_v57  ;;  %v2020_v43 = vld [vmem:[#allocation2 + $0x20] sm:$0xff]  ;;  %v2019_v26 = vld [vmem:[#allocation2 + $0x18] sm:$0xff] }
 0x5a3   :  { %2521 = vmatpush3.msra.mxu0 %v2028_v56  ;;  %v2018_v29 = vld [vmem:[#allocation2 + $0x10] sm:$0xff]  ;;  %v2017_v63 = vld [vmem:[#allocation2 + $0x8] sm:$0xff] }
 0x5a4   :  { %2522 = vmatprep.subr.mxu0 %v2678_v57  ;;  %v2016_v45 = vld [vmem:[#allocation2] sm:$0xff] }
 0x5a5   :  { %2523 = vmatpush3.msra.mxu0 %v2027_v32 }
 0x5a6   :  { %2524 = vmatprep.subr.mxu0 %v2678_v57 }
 0x5a7   :  { %2525 = vmatpush3.msra.mxu0 %v2026_v16 }
 0x5a8   :  { %2526 = vmatprep.subr.mxu0 %v2678_v57 }
 0x5a9   :  { %2527 = vmatpush3.msra.mxu0 %v2025_v13 }
 0x5aa   :  { %2528 = vmatprep.subr.mxu0 %v2678_v57 }
 0x5ab   :  { %2529 = vmatpush3.msra.mxu0 %v2024_v54 }
 0x5ac   :  { %2530 = vmatprep.subr.mxu0 %v2678_v57 }
 0x5ad   :  { %2531 = vmatpush3.msra.mxu0 %v2023_v41 }
 0x5ae   :  { %2532 = vmatprep.subr.mxu0 %v2678_v57 }
 0x5af   :  { %2533 = vmatpush3.msra.mxu0 %v2022_v6 }
 0x5b0   :  { %2534 = vmatprep.subr.mxu0 %v2678_v57 }
 0x5b1   :  { %2535 = vmatpush3.msra.mxu0 %v2021_v33 }
 0x5b2   :  { %2536 = vmatprep.subr.mxu0 %v2678_v57 }
 0x5b3   :  { %2537 = vmatpush3.msra.mxu0 %v2020_v43 }
 0x5b4   :  { %2538 = vmatprep.subr.mxu0 %v2678_v57 }
 0x5b5   :  { %2539 = vmatpush3.msra.mxu0 %v2019_v26 }
 0x5b6   :  { %2540 = vmatprep.subr.mxu0 %v2678_v57 }
 0x5b7   :  { %2541 = vmatpush3.msra.mxu0 %v2018_v29 }
 0x5b8   :  { %2542 = vmatprep.subr.mxu0 %v2678_v57 }
 0x5b9   :  { %2543 = vmatpush3.msra.mxu0 %v2017_v63 }
 0x5ba   :  { %2544 = vmatprep.subr.mxu0 %v2678_v57 }
 0x5bb   :  { %2545 = vmatpush3.msra.mxu0 %v2016_v45 }
 0x5bc   :  { %2547 = vmatmul.mubr.f32.vlgmr.msra.gmra.mxu0 %v2015_v14 }
 0x67c   :  { %v2098_v50 = vpop.f32.mrf.mxu0 }
 0x67d   :  { %2103 = vst.msk [vmem:[#allocation3] sm:$0x3] %vm2102_vm3, %v2098_v50 }
 0x67e   :  { %v2548_v46 = vpop.f32.mrf.mxu0 }
 0x67f   :  { %2666 = shalt.err (!%p2663_p4)
}
 0x680   :  { %2113 = dma.vmem_to_hbm [thread:$0]  %s2111_s2, 32, %s3821_s12, [#allocation4]  }
 0x681   :  { %2675 = dma.done.wait [#allocation4], 32  }
 0x682   :  { %2676 = vsyncadd [#allocation4], 4294967264 }
 0x683   :  { %2117 = vsyncpa [#allocation4], 1 }

</bundles_post_ra>
